<compile_context>
chip_gen: v7x
topology: tpu7x:2x2x1
jax: 0.10.0
libtpu: 0.0.40
codegen_flags: <defaults>
</compile_context>

<pallas_src>
import functools
import numpy as np
import jax
import jax.numpy as jnp
from jax.experimental import pallas as pl
from jax.experimental.pallas import tpu as pltpu

F32 = jnp.float32
BF16 = jnp.bfloat16
EMB = 64      # emb_dim
GB = 8        # patients per grid step (fills the 8 sublanes of each vreg)


def _round_up(n, m):
    return ((n + m - 1) // m) * m


def _cdiv(a, b):
    return (a + b - 1) // b


# ----------------------------- fused Pallas kernel -----------------------------

def _retain_kernel(counts_ref, emb_ref, wih_ref, whh_ref, gib_ref, bhn_ref,
                   wb_ref, bb_ref, wo_ref, bo_ref, o_ref, hb_ref):
    E = emb_ref.shape[1]
    B = o_ref.shape[0]                      # patients in this grid step (== GB)
    T = counts_ref.shape[0] // B            # visits (time steps), rows are time-major

    # 1) embedding lookup + per-visit sum as one multi-hot matmul (bf16 MXU, f32 acc)
    x = jnp.dot(counts_ref[...], emb_ref[...], preferred_element_type=F32)   # (T*B, E)

    # 2) input-to-hidden projection for ALL timesteps at once (hoisted off the loop).
    #    gib already contains b_ih plus the folded b_hr / b_hz hidden biases.
    gi = jnp.dot(x, wih_ref[...], preferred_element_type=F32) + gib_ref[...]  # (T*B, 3E)

    whh = whh_ref[...]                      # (E, 3E), gate order (r, z, n)
    bhn = bhn_ref[...]                      # (1, E)   hidden bias of the n gate

    # 3) serial beta-GRU recurrence — only one MXU round-trip per step.
    #    NOTE: attn_g = softmax(alpha_li(g), dim=-1) over a size-1 axis == 1.0 exactly,
    #    so the alpha GRU branch of the reference contributes nothing and is omitted.
    h = jnp.zeros((B, E), F32)
    for t in range(T):                      # T is small & static -> trace-time unrolled
        gi_t = gi[t * B:(t + 1) * B, :]                              # (B, 3E)
        gh = jnp.dot(h, whh, preferred_element_type=F32)             # (B, 3E)
        rz = jax.nn.sigmoid(gi_t[:, :2 * E] + gh[:, :2 * E])         # one 128-lane EUP slab
        r = rz[:, :E]
        z = rz[:, E:]
        n = jnp.tanh(gi_t[:, 2 * E:] + r * (gh[:, 2 * E:] + bhn))
        h = (1.0 - z) * n + z * h
        hb_ref[t * B:(t + 1) * B, :] = h                             # stack hidden states

    # 4) beta attention for all timesteps at once (hoisted off the recurrence)
    hb = hb_ref[...]                                                 # (T*B, E)
    attn_h = jnp.tanh(jnp.dot(hb, wb_ref[...], preferred_element_type=F32) + bb_ref[...])
    weighted = attn_h * x                                            # (T*B, E)

    # 5) per-patient context: sum over the T time blocks (attn_g == 1.0)
    c = weighted[0:B, :]
    for t in range(1, T):
        c = c + weighted[t * B:(t + 1) * B, :]

    # 6) output linear — bf16 weights, lane-dense (padded to a multiple of 128 lanes)
    o_ref[...] = jnp.dot(c.astype(BF16), wo_ref[...],
                         preferred_element_type=F32) + bo_ref[...]


# ----------------------------- device-side wrapper -----------------------------

@functools.partial(jax.jit, static_argnames=("T",))
def _retain_device(kp, counts, *, T):
    V, E = kp['emb'].shape
    out_pad = kp['out_w_pad'].shape[1]
    G = counts.shape[0] // (T * GB)         # number of patient groups (grid size)

    def full(a):
        return pl.BlockSpec(a.shape, lambda i, _nd=a.ndim: (0,) * _nd)

    grid_spec = pltpu.PrefetchScalarGridSpec(
        num_scalar_prefetch=0,
        grid=(G,),
        in_specs=[
            pl.BlockSpec((GB * T, V), lambda i: (i, 0)),   # multi-hot counts (time-major)
            full(kp['emb']),
            full(kp['gru_wih']), full(kp['gru_whh']),
            full(kp['gru_bi_fold']), full(kp['gru_bhn']),
            full(kp['beta_w']), full(kp['beta_b']),
            full(kp['out_w_pad']), full(kp['out_b_pad']),
        ],
        out_specs=pl.BlockSpec((GB, out_pad), lambda i: (i, 0)),
        scratch_shapes=[pltpu.VMEM((GB * T, E), F32)],     # stacked beta-GRU hidden states
    )
    return pl.pallas_call(
        _retain_kernel,
        out_shape=jax.ShapeDtypeStruct((G * GB, out_pad), F32),
        grid_spec=grid_spec,
        compiler_params=pltpu.CompilerParams(dimension_semantics=("parallel",)),
    )(counts, kp['emb'], kp['gru_wih'], kp['gru_whh'], kp['gru_bi_fold'],
      kp['gru_bhn'], kp['beta_w'], kp['beta_b'], kp['out_w_pad'], kp['out_b_pad'])


def _make_counts(patients, voc_size, T, Bp):
    """Ragged code lists -> multi-hot counts, rows ordered [group, time, patient-in-group]."""
    v0, v1, v2 = voc_size
    V = v0 + v1 + v2
    G = Bp // GB
    counts = np.zeros((G, T, GB, V), np.float32)
    for b, visits in enumerate(patients):
        g, p = divmod(b, GB)
        for t, visit in enumerate(visits):
            for code in visit[0]:
                counts[g, t, p, int(code)] += 1.0
            for code in visit[1]:
                counts[g, t, p, int(code) + v0] += 1.0
            for code in visit[2]:
                counts[g, t, p, int(code) + v0 + v1] += 1.0
    return counts.reshape(G * T * GB, V)


def retain_forward_batch(params, patients, voc_size):
    """patients: list of patients; each patient is a list of visits [diag, proc, med]."""
    v0, v1, v2 = voc_size
    B = len(patients)
    T = max(1, max(len(vs) for vs in patients))
    Bp = GB * _cdiv(B, GB)
    # Padding (extra visits / extra patients) is all-zero counts -> exact zero
    # contribution to the context, so padding at the end is numerically exact.
    counts = _make_counts(patients, voc_size, T, Bp).astype(BF16)
    kparams = {k: v for k, v in params.items() if k != 'raw'}
    out = _retain_device(kparams, jnp.asarray(counts), T=T)
    return out[:B, :v2]


def retain_forward(params, inputs, voc_size):
    """Single-patient forward matching the PyTorch module signature -> (1, voc_size[2])."""
    return retain_forward_batch(params, [inputs], voc_size)


# ----------------------------- params -----------------------------

def init_params(key, voc_size, emb_dim=EMB):
    v0, v1, v2 = voc_size
    V = v0 + v1 + v2
    E = emb_dim
    ks = iter(jax.random.split(key, 24))

    def u(shape, s=0.1):
        return jax.random.uniform(next(ks), shape, F32, -s, s)

    raw = {}
    emb_full = jax.random.normal(next(ks), (V + 1, E), F32)
    emb_full = emb_full.at[V].set(0.0)        # padding_idx row (never hit by counts matmul)
    raw['emb'] = emb_full[:V].astype(BF16)    # vocab-scaled weight kept in bf16

    # beta GRU (weights stored (in_features, 3*hidden), gate order (r, z, n))
    raw['b_wih'] = u((E, 3 * E)); raw['b_whh'] = u((E, 3 * E))
    raw['b_bih'] = u((3 * E,));   raw['b_bhh'] = u((3 * E,))
    # alpha GRU + alpha_li: mathematically dead in the forward (softmax over size-1 axis);
    # kept only so the pure-JAX reference below can run the full original computation.
    raw['a_wih'] = u((E, 3 * E)); raw['a_whh'] = u((E, 3 * E))
    raw['a_bih'] = u((3 * E,));   raw['a_bhh'] = u((3 * E,))
    raw['alpha_w'] = u((E, 1));   raw['alpha_b'] = u((1,))
    raw['beta_w'] = u((E, E));    raw['beta_b'] = u((E,))
    raw['out_w'] = u((E, v2));    raw['out_b'] = u((v2,))

    out_pad = max(128, _round_up(v2, 128))
    p = {'raw': raw}
    p['emb'] = raw['emb']
    p['gru_wih'] = raw['b_wih']
    p['gru_whh'] = raw['b_whh']
    # fold b_hr / b_hz into the hoisted input-side bias; b_hn must stay inside r*(...)
    gib = raw['b_bih'] + jnp.concatenate([raw['b_bhh'][:2 * E], jnp.zeros((E,), F32)])
    p['gru_bi_fold'] = gib[None, :]                    # (1, 3E)
    p['gru_bhn'] = raw['b_bhh'][2 * E:][None, :]       # (1, E)
    p['beta_w'] = raw['beta_w']
    p['beta_b'] = raw['beta_b'][None, :]
    p['out_w_pad'] = (jnp.zeros((E, out_pad), F32).at[:, :v2]
                      .set(raw['out_w'])).astype(BF16)
    p['out_b_pad'] = jnp.zeros((1, out_pad), F32).at[0, :v2].set(raw['out_b'])
    return p


# ----------------------------- pure-JAX reference (for validation) -----------------------------

def _gru_scan(x, wih, whh, bih, bhh):
    E = x.shape[-1]

    def step(h, x_t):
        gi = x_t @ wih + bih
        gh = h @ whh + bhh
        r = jax.nn.sigmoid(gi[:E] + gh[:E])
        z = jax.nn.sigmoid(gi[E:2 * E] + gh[E:2 * E])
        n = jnp.tanh(gi[2 * E:] + r * gh[2 * E:])
        h = (1.0 - z) * n + z * h
        return h, h

    _, hs = jax.lax.scan(step, jnp.zeros((E,), F32), x)
    return hs


def retain_reference(params, visits, voc_size):
    """Pure-JAX re-implementation of the full PyTorch module (eval mode), one patient."""
    raw = params['raw']
    v0, v1, v2 = voc_size
    V = v0 + v1 + v2
    T = len(visits)
    counts = np.zeros((T, V), np.float32)
    for t, visit in enumerate(visits):
        for code in visit[0]:
            counts[t, int(code)] += 1.0
        for code in visit[1]:
            counts[t, int(code) + v0] += 1.0
        for code in visit[2]:
            counts[t, int(code) + v0 + v1] += 1.0
    x = jnp.asarray(counts) @ raw['emb'].astype(F32)                       # (T, E)
    g = _gru_scan(x, raw['a_wih'], raw['a_whh'], raw['a_bih'], raw['a_bhh'])
    h = _gru_scan(x, raw['b_wih'], raw['b_whh'], raw['b_bih'], raw['b_bhh'])
    attn_g = jax.nn.softmax(g @ raw['alpha_w'] + raw['alpha_b'], axis=-1)  # (T,1) == 1.0
    attn_h = jnp.tanh(h @ raw['beta_w'] + raw['beta_b'])
    c = jnp.sum(attn_g * attn_h * x, axis=0, keepdims=True)               # (1, E)
    out_w = params['out_w_pad'][:, :v2].astype(F32)
    out_b = params['out_b_pad'][0, :v2]
    return c @ out_w + out_b


# ----------------------------- demo / smoke test -----------------------------

if __name__ == "__main__":
    voc_size = (10, 12, 14)                 # (diag, proc, med) vocab sizes
    params = init_params(jax.random.PRNGKey(0), voc_size)

    # deterministic synthetic cohort: 10 patients, 2-6 visits each, small code lists
    rng = np.random.default_rng(0)
    n_patients = 10
    patients = []
    for _ in range(n_patients):
        n_visits = int(rng.integers(2, 7))
        visits = []
        for _ in range(n_visits):
            d = rng.integers(0, voc_size[0], size=int(rng.integers(1, 5))).tolist()
            pr = rng.integers(0, voc_size[1], size=int(rng.integers(1, 5))).tolist()
            m = rng.integers(0, voc_size[2], size=int(rng.integers(1, 5))).tolist()
            visits.append([d, pr, m])
        patients.append(visits)

    out = retain_forward_batch(params, patients, voc_size)
    jax.block_until_ready(out)
    assert out.shape == (n_patients, voc_size[2])
    assert bool(jnp.all(jnp.isfinite(out)))

    # numerics check vs. a pure-JAX re-implementation of the full original module
    ref = jnp.concatenate([retain_reference(params, vs, voc_size) for vs in patients], axis=0)
    max_err = float(jnp.max(jnp.abs(out - ref)))
    assert jnp.allclose(out, ref, rtol=5e-2, atol=5e-2), f"max_abs_err={max_err}"

    # single-patient API identical to the PyTorch module's forward signature
    out1 = retain_forward(params, patients[0], voc_size)
    jax.block_until_ready(out1)
    assert out1.shape == (1, voc_size[2])

    print("KERNEL_OK")
</pallas_src>

<mosaic_0001>
module attributes {stable_mosaic.version = 11 : i64} {
  func.func @_retain_kernel(%arg0: i32, %arg1: memref<48x36xbf16, #tpu.memory_space<vmem>>, %arg2: memref<36x64xbf16, #tpu.memory_space<vmem>>, %arg3: memref<64x192xf32, #tpu.memory_space<vmem>>, %arg4: memref<64x192xf32, #tpu.memory_space<vmem>>, %arg5: memref<1x192xf32, #tpu.memory_space<vmem>>, %arg6: memref<1x64xf32, #tpu.memory_space<vmem>>, %arg7: memref<64x64xf32, #tpu.memory_space<vmem>>, %arg8: memref<1x64xf32, #tpu.memory_space<vmem>>, %arg9: memref<64x128xbf16, #tpu.memory_space<vmem>>, %arg10: memref<1x128xf32, #tpu.memory_space<vmem>>, %arg11: memref<8x128xf32, #tpu.memory_space<vmem>>, %arg12: memref<48x64xf32, #tpu.memory_space<vmem>>) attributes {dimension_semantics = [#tpu.dimension_semantics<parallel>], iteration_bounds = array<i64: 2>, scalar_prefetch = 0 : i64, scratch_operands = 1 : i64, tpu.core_type = #tpu.core_type<tc>, window_params = [{transform_indices = @transform_0, window_bounds = array<i64: 48, 36>}, {pipeline_mode = #tpu.pipeline_mode<synchronous>, transform_indices = @transform_1, window_bounds = array<i64: 36, 64>}, {pipeline_mode = #tpu.pipeline_mode<synchronous>, transform_indices = @transform_2, window_bounds = array<i64: 64, 192>}, {pipeline_mode = #tpu.pipeline_mode<synchronous>, transform_indices = @transform_3, window_bounds = array<i64: 64, 192>}, {pipeline_mode = #tpu.pipeline_mode<synchronous>, transform_indices = @transform_4, window_bounds = array<i64: 1, 192>}, {pipeline_mode = #tpu.pipeline_mode<synchronous>, transform_indices = @transform_5, window_bounds = array<i64: 1, 64>}, {pipeline_mode = #tpu.pipeline_mode<synchronous>, transform_indices = @transform_6, window_bounds = array<i64: 64, 64>}, {pipeline_mode = #tpu.pipeline_mode<synchronous>, transform_indices = @transform_7, window_bounds = array<i64: 1, 64>}, {pipeline_mode = #tpu.pipeline_mode<synchronous>, transform_indices = @transform_8, window_bounds = array<i64: 64, 128>}, {pipeline_mode = #tpu.pipeline_mode<synchronous>, transform_indices = @transform_9, window_bounds = array<i64: 1, 128>}, {transform_indices = @transform_10, window_bounds = array<i64: 8, 128>}]} {
    %c0 = arith.constant 0 : index
    %c0_0 = arith.constant 0 : index
    %0 = vector.load %arg1[%c0, %c0_0] : memref<48x36xbf16, #tpu.memory_space<vmem>>, vector<48x36xbf16>
    %c0_1 = arith.constant 0 : index
    %c0_2 = arith.constant 0 : index
    %1 = vector.load %arg2[%c0_1, %c0_2] : memref<36x64xbf16, #tpu.memory_space<vmem>>, vector<36x64xbf16>
    %cst = arith.constant dense<0.000000e+00> : vector<48x64xf32>
    %2 = tpu.matmul %0, %1, %cst {dimension_numbers = #tpu.dot_dimension_numbers<[1], [0], [0], [1], [0, 0, 1, 1], [], []>} : vector<48x36xbf16>, vector<36x64xbf16>, vector<48x64xf32> -> vector<48x64xf32>
    %c0_3 = arith.constant 0 : index
    %c0_4 = arith.constant 0 : index
    %3 = vector.load %arg3[%c0_3, %c0_4] : memref<64x192xf32, #tpu.memory_space<vmem>>, vector<64x192xf32>
    %cst_5 = arith.constant dense<0.000000e+00> : vector<48x192xf32>
    %4 = tpu.matmul %2, %3, %cst_5 {dimension_numbers = #tpu.dot_dimension_numbers<[1], [0], [0], [1], [0, 0, 1, 1], [], []>} : vector<48x64xf32>, vector<64x192xf32>, vector<48x192xf32> -> vector<48x192xf32>
    %c0_6 = arith.constant 0 : index
    %c0_7 = arith.constant 0 : index
    %5 = vector.load %arg5[%c0_6, %c0_7] : memref<1x192xf32, #tpu.memory_space<vmem>>, vector<1x192xf32>
    %6 = vector.broadcast %5 : vector<1x192xf32> to vector<48x192xf32>
    %7 = arith.addf %4, %6 : vector<48x192xf32>
    %c0_8 = arith.constant 0 : index
    %c0_9 = arith.constant 0 : index
    %8 = vector.load %arg4[%c0_8, %c0_9] : memref<64x192xf32, #tpu.memory_space<vmem>>, vector<64x192xf32>
    %c0_10 = arith.constant 0 : index
    %c0_11 = arith.constant 0 : index
    %9 = vector.load %arg6[%c0_10, %c0_11] : memref<1x64xf32, #tpu.memory_space<vmem>>, vector<1x64xf32>
    %cst_12 = arith.constant 0.000000e+00 : f32
    %10 = vector.broadcast %cst_12 : f32 to vector<8x64xf32>
    %11 = vector.extract_strided_slice %7 {offsets = [0, 0], sizes = [8, 192], strides = [1, 1]} : vector<48x192xf32> to vector<8x192xf32>
    %cst_13 = arith.constant dense<0.000000e+00> : vector<8x192xf32>
    %12 = tpu.matmul %10, %8, %cst_13 {dimension_numbers = #tpu.dot_dimension_numbers<[1], [0], [0], [1], [0, 0, 1, 1], [], []>} : vector<8x64xf32>, vector<64x192xf32>, vector<8x192xf32> -> vector<8x192xf32>
    %13 = vector.extract_strided_slice %11 {offsets = [0, 0], sizes = [8, 128], strides = [1, 1]} : vector<8x192xf32> to vector<8x128xf32>
    %14 = vector.extract_strided_slice %12 {offsets = [0, 0], sizes = [8, 128], strides = [1, 1]} : vector<8x192xf32> to vector<8x128xf32>
    %15 = arith.addf %13, %14 : vector<8x128xf32>
    %16 = arith.negf %15 : vector<8x128xf32>
    %17 = math.exp %16 : vector<8x128xf32>
    %cst_14 = arith.constant 1.000000e+00 : f32
    %18 = vector.broadcast %cst_14 : f32 to vector<8x128xf32>
    %19 = arith.addf %18, %17 : vector<8x128xf32>
    %20 = arith.divf %18, %19 : vector<8x128xf32>
    %21 = vector.extract_strided_slice %20 {offsets = [0, 0], sizes = [8, 64], strides = [1, 1]} : vector<8x128xf32> to vector<8x64xf32>
    %22 = vector.extract_strided_slice %20 {offsets = [0, 64], sizes = [8, 64], strides = [1, 1]} : vector<8x128xf32> to vector<8x64xf32>
    %23 = vector.extract_strided_slice %11 {offsets = [0, 128], sizes = [8, 64], strides = [1, 1]} : vector<8x192xf32> to vector<8x64xf32>
    %24 = vector.extract_strided_slice %12 {offsets = [0, 128], sizes = [8, 64], strides = [1, 1]} : vector<8x192xf32> to vector<8x64xf32>
    %25 = vector.broadcast %9 : vector<1x64xf32> to vector<8x64xf32>
    %26 = arith.addf %24, %25 : vector<8x64xf32>
    %27 = arith.mulf %21, %26 : vector<8x64xf32>
    %28 = arith.addf %23, %27 : vector<8x64xf32>
    %29 = math.tanh %28 : vector<8x64xf32>
    %cst_15 = arith.constant 1.000000e+00 : f32
    %30 = vector.broadcast %cst_15 : f32 to vector<8x64xf32>
    %31 = arith.subf %30, %22 : vector<8x64xf32>
    %32 = arith.mulf %31, %29 : vector<8x64xf32>
    %33 = arith.mulf %22, %10 : vector<8x64xf32>
    %34 = arith.addf %32, %33 : vector<8x64xf32>
    %c0_16 = arith.constant 0 : index
    %c0_17 = arith.constant 0 : index
    %35 = vector.load %arg12[%c0_16, %c0_17] : memref<48x64xf32, #tpu.memory_space<vmem>>, vector<8x64xf32>
    tpu.vector_store %arg12[%c0_16, %c0_17], %34 {strides = array<i32>} : memref<48x64xf32, #tpu.memory_space<vmem>>, vector<8x64xf32>,
    %36 = vector.extract_strided_slice %7 {offsets = [8, 0], sizes = [8, 192], strides = [1, 1]} : vector<48x192xf32> to vector<8x192xf32>
    %cst_18 = arith.constant dense<0.000000e+00> : vector<8x192xf32>
    %37 = tpu.matmul %34, %8, %cst_18 {dimension_numbers = #tpu.dot_dimension_numbers<[1], [0], [0], [1], [0, 0, 1, 1], [], []>} : vector<8x64xf32>, vector<64x192xf32>, vector<8x192xf32> -> vector<8x192xf32>
    %38 = vector.extract_strided_slice %36 {offsets = [0, 0], sizes = [8, 128], strides = [1, 1]} : vector<8x192xf32> to vector<8x128xf32>
    %39 = vector.extract_strided_slice %37 {offsets = [0, 0], sizes = [8, 128], strides = [1, 1]} : vector<8x192xf32> to vector<8x128xf32>
    %40 = arith.addf %38, %39 : vector<8x128xf32>
    %41 = arith.negf %40 : vector<8x128xf32>
    %42 = math.exp %41 : vector<8x128xf32>
    %cst_19 = arith.constant 1.000000e+00 : f32
    %43 = vector.broadcast %cst_19 : f32 to vector<8x128xf32>
    %44 = arith.addf %43, %42 : vector<8x128xf32>
    %45 = arith.divf %43, %44 : vector<8x128xf32>
    %46 = vector.extract_strided_slice %45 {offsets = [0, 0], sizes = [8, 64], strides = [1, 1]} : vector<8x128xf32> to vector<8x64xf32>
    %47 = vector.extract_strided_slice %45 {offsets = [0, 64], sizes = [8, 64], strides = [1, 1]} : vector<8x128xf32> to vector<8x64xf32>
    %48 = vector.extract_strided_slice %36 {offsets = [0, 128], sizes = [8, 64], strides = [1, 1]} : vector<8x192xf32> to vector<8x64xf32>
    %49 = vector.extract_strided_slice %37 {offsets = [0, 128], sizes = [8, 64], strides = [1, 1]} : vector<8x192xf32> to vector<8x64xf32>
    %50 = vector.broadcast %9 : vector<1x64xf32> to vector<8x64xf32>
    %51 = arith.addf %49, %50 : vector<8x64xf32>
    %52 = arith.mulf %46, %51 : vector<8x64xf32>
    %53 = arith.addf %48, %52 : vector<8x64xf32>
    %54 = math.tanh %53 : vector<8x64xf32>
    %cst_20 = arith.constant 1.000000e+00 : f32
    %55 = vector.broadcast %cst_20 : f32 to vector<8x64xf32>
    %56 = arith.subf %55, %47 : vector<8x64xf32>
    %57 = arith.mulf %56, %54 : vector<8x64xf32>
    %58 = arith.mulf %47, %34 : vector<8x64xf32>
    %59 = arith.addf %57, %58 : vector<8x64xf32>
    %c8 = arith.constant 8 : index
    %c0_21 = arith.constant 0 : index
    %60 = vector.load %arg12[%c8, %c0_21] : memref<48x64xf32, #tpu.memory_space<vmem>>, vector<8x64xf32>
    tpu.vector_store %arg12[%c8, %c0_21], %59 {strides = array<i32>} : memref<48x64xf32, #tpu.memory_space<vmem>>, vector<8x64xf32>,
    %61 = vector.extract_strided_slice %7 {offsets = [16, 0], sizes = [8, 192], strides = [1, 1]} : vector<48x192xf32> to vector<8x192xf32>
    %cst_22 = arith.constant dense<0.000000e+00> : vector<8x192xf32>
    %62 = tpu.matmul %59, %8, %cst_22 {dimension_numbers = #tpu.dot_dimension_numbers<[1], [0], [0], [1], [0, 0, 1, 1], [], []>} : vector<8x64xf32>, vector<64x192xf32>, vector<8x192xf32> -> vector<8x192xf32>
    %63 = vector.extract_strided_slice %61 {offsets = [0, 0], sizes = [8, 128], strides = [1, 1]} : vector<8x192xf32> to vector<8x128xf32>
    %64 = vector.extract_strided_slice %62 {offsets = [0, 0], sizes = [8, 128], strides = [1, 1]} : vector<8x192xf32> to vector<8x128xf32>
    %65 = arith.addf %63, %64 : vector<8x128xf32>
    %66 = arith.negf %65 : vector<8x128xf32>
    %67 = math.exp %66 : vector<8x128xf32>
    %cst_23 = arith.constant 1.000000e+00 : f32
    %68 = vector.broadcast %cst_23 : f32 to vector<8x128xf32>
    %69 = arith.addf %68, %67 : vector<8x128xf32>
    %70 = arith.divf %68, %69 : vector<8x128xf32>
    %71 = vector.extract_strided_slice %70 {offsets = [0, 0], sizes = [8, 64], strides = [1, 1]} : vector<8x128xf32> to vector<8x64xf32>
    %72 = vector.extract_strided_slice %70 {offsets = [0, 64], sizes = [8, 64], strides = [1, 1]} : vector<8x128xf32> to vector<8x64xf32>
    %73 = vector.extract_strided_slice %61 {offsets = [0, 128], sizes = [8, 64], strides = [1, 1]} : vector<8x192xf32> to vector<8x64xf32>
    %74 = vector.extract_strided_slice %62 {offsets = [0, 128], sizes = [8, 64], strides = [1, 1]} : vector<8x192xf32> to vector<8x64xf32>
    %75 = vector.broadcast %9 : vector<1x64xf32> to vector<8x64xf32>
    %76 = arith.addf %74, %75 : vector<8x64xf32>
    %77 = arith.mulf %71, %76 : vector<8x64xf32>
    %78 = arith.addf %73, %77 : vector<8x64xf32>
    %79 = math.tanh %78 : vector<8x64xf32>
    %cst_24 = arith.constant 1.000000e+00 : f32
    %80 = vector.broadcast %cst_24 : f32 to vector<8x64xf32>
    %81 = arith.subf %80, %72 : vector<8x64xf32>
    %82 = arith.mulf %81, %79 : vector<8x64xf32>
    %83 = arith.mulf %72, %59 : vector<8x64xf32>
    %84 = arith.addf %82, %83 : vector<8x64xf32>
    %c16 = arith.constant 16 : index
    %c0_25 = arith.constant 0 : index
    %85 = vector.load %arg12[%c16, %c0_25] : memref<48x64xf32, #tpu.memory_space<vmem>>, vector<8x64xf32>
    tpu.vector_store %arg12[%c16, %c0_25], %84 {strides = array<i32>} : memref<48x64xf32, #tpu.memory_space<vmem>>, vector<8x64xf32>,
    %86 = vector.extract_strided_slice %7 {offsets = [24, 0], sizes = [8, 192], strides = [1, 1]} : vector<48x192xf32> to vector<8x192xf32>
    %cst_26 = arith.constant dense<0.000000e+00> : vector<8x192xf32>
    %87 = tpu.matmul %84, %8, %cst_26 {dimension_numbers = #tpu.dot_dimension_numbers<[1], [0], [0], [1], [0, 0, 1, 1], [], []>} : vector<8x64xf32>, vector<64x192xf32>, vector<8x192xf32> -> vector<8x192xf32>
    %88 = vector.extract_strided_slice %86 {offsets = [0, 0], sizes = [8, 128], strides = [1, 1]} : vector<8x192xf32> to vector<8x128xf32>
    %89 = vector.extract_strided_slice %87 {offsets = [0, 0], sizes = [8, 128], strides = [1, 1]} : vector<8x192xf32> to vector<8x128xf32>
    %90 = arith.addf %88, %89 : vector<8x128xf32>
    %91 = arith.negf %90 : vector<8x128xf32>
    %92 = math.exp %91 : vector<8x128xf32>
    %cst_27 = arith.constant 1.000000e+00 : f32
    %93 = vector.broadcast %cst_27 : f32 to vector<8x128xf32>
    %94 = arith.addf %93, %92 : vector<8x128xf32>
    %95 = arith.divf %93, %94 : vector<8x128xf32>
    %96 = vector.extract_strided_slice %95 {offsets = [0, 0], sizes = [8, 64], strides = [1, 1]} : vector<8x128xf32> to vector<8x64xf32>
    %97 = vector.extract_strided_slice %95 {offsets = [0, 64], sizes = [8, 64], strides = [1, 1]} : vector<8x128xf32> to vector<8x64xf32>
    %98 = vector.extract_strided_slice %86 {offsets = [0, 128], sizes = [8, 64], strides = [1, 1]} : vector<8x192xf32> to vector<8x64xf32>
    %99 = vector.extract_strided_slice %87 {offsets = [0, 128], sizes = [8, 64], strides = [1, 1]} : vector<8x192xf32> to vector<8x64xf32>
    %100 = vector.broadcast %9 : vector<1x64xf32> to vector<8x64xf32>
    %101 = arith.addf %99, %100 : vector<8x64xf32>
    %102 = arith.mulf %96, %101 : vector<8x64xf32>
    %103 = arith.addf %98, %102 : vector<8x64xf32>
    %104 = math.tanh %103 : vector<8x64xf32>
    %cst_28 = arith.constant 1.000000e+00 : f32
    %105 = vector.broadcast %cst_28 : f32 to vector<8x64xf32>
    %106 = arith.subf %105, %97 : vector<8x64xf32>
    %107 = arith.mulf %106, %104 : vector<8x64xf32>
    %108 = arith.mulf %97, %84 : vector<8x64xf32>
    %109 = arith.addf %107, %108 : vector<8x64xf32>
    %c24 = arith.constant 24 : index
    %c0_29 = arith.constant 0 : index
    %110 = vector.load %arg12[%c24, %c0_29] : memref<48x64xf32, #tpu.memory_space<vmem>>, vector<8x64xf32>
    tpu.vector_store %arg12[%c24, %c0_29], %109 {strides = array<i32>} : memref<48x64xf32, #tpu.memory_space<vmem>>, vector<8x64xf32>,
    %111 = vector.extract_strided_slice %7 {offsets = [32, 0], sizes = [8, 192], strides = [1, 1]} : vector<48x192xf32> to vector<8x192xf32>
    %cst_30 = arith.constant dense<0.000000e+00> : vector<8x192xf32>
    %112 = tpu.matmul %109, %8, %cst_30 {dimension_numbers = #tpu.dot_dimension_numbers<[1], [0], [0], [1], [0, 0, 1, 1], [], []>} : vector<8x64xf32>, vector<64x192xf32>, vector<8x192xf32> -> vector<8x192xf32>
    %113 = vector.extract_strided_slice %111 {offsets = [0, 0], sizes = [8, 128], strides = [1, 1]} : vector<8x192xf32> to vector<8x128xf32>
    %114 = vector.extract_strided_slice %112 {offsets = [0, 0], sizes = [8, 128], strides = [1, 1]} : vector<8x192xf32> to vector<8x128xf32>
    %115 = arith.addf %113, %114 : vector<8x128xf32>
    %116 = arith.negf %115 : vector<8x128xf32>
    %117 = math.exp %116 : vector<8x128xf32>
    %cst_31 = arith.constant 1.000000e+00 : f32
    %118 = vector.broadcast %cst_31 : f32 to vector<8x128xf32>
    %119 = arith.addf %118, %117 : vector<8x128xf32>
    %120 = arith.divf %118, %119 : vector<8x128xf32>
    %121 = vector.extract_strided_slice %120 {offsets = [0, 0], sizes = [8, 64], strides = [1, 1]} : vector<8x128xf32> to vector<8x64xf32>
    %122 = vector.extract_strided_slice %120 {offsets = [0, 64], sizes = [8, 64], strides = [1, 1]} : vector<8x128xf32> to vector<8x64xf32>
    %123 = vector.extract_strided_slice %111 {offsets = [0, 128], sizes = [8, 64], strides = [1, 1]} : vector<8x192xf32> to vector<8x64xf32>
    %124 = vector.extract_strided_slice %112 {offsets = [0, 128], sizes = [8, 64], strides = [1, 1]} : vector<8x192xf32> to vector<8x64xf32>
    %125 = vector.broadcast %9 : vector<1x64xf32> to vector<8x64xf32>
    %126 = arith.addf %124, %125 : vector<8x64xf32>
    %127 = arith.mulf %121, %126 : vector<8x64xf32>
    %128 = arith.addf %123, %127 : vector<8x64xf32>
    %129 = math.tanh %128 : vector<8x64xf32>
    %cst_32 = arith.constant 1.000000e+00 : f32
    %130 = vector.broadcast %cst_32 : f32 to vector<8x64xf32>
    %131 = arith.subf %130, %122 : vector<8x64xf32>
    %132 = arith.mulf %131, %129 : vector<8x64xf32>
    %133 = arith.mulf %122, %109 : vector<8x64xf32>
    %134 = arith.addf %132, %133 : vector<8x64xf32>
    %c32 = arith.constant 32 : index
    %c0_33 = arith.constant 0 : index
    %135 = vector.load %arg12[%c32, %c0_33] : memref<48x64xf32, #tpu.memory_space<vmem>>, vector<8x64xf32>
    tpu.vector_store %arg12[%c32, %c0_33], %134 {strides = array<i32>} : memref<48x64xf32, #tpu.memory_space<vmem>>, vector<8x64xf32>,
    %136 = vector.extract_strided_slice %7 {offsets = [40, 0], sizes = [8, 192], strides = [1, 1]} : vector<48x192xf32> to vector<8x192xf32>
    %cst_34 = arith.constant dense<0.000000e+00> : vector<8x192xf32>
    %137 = tpu.matmul %134, %8, %cst_34 {dimension_numbers = #tpu.dot_dimension_numbers<[1], [0], [0], [1], [0, 0, 1, 1], [], []>} : vector<8x64xf32>, vector<64x192xf32>, vector<8x192xf32> -> vector<8x192xf32>
    %138 = vector.extract_strided_slice %136 {offsets = [0, 0], sizes = [8, 128], strides = [1, 1]} : vector<8x192xf32> to vector<8x128xf32>
    %139 = vector.extract_strided_slice %137 {offsets = [0, 0], sizes = [8, 128], strides = [1, 1]} : vector<8x192xf32> to vector<8x128xf32>
    %140 = arith.addf %138, %139 : vector<8x128xf32>
    %141 = arith.negf %140 : vector<8x128xf32>
    %142 = math.exp %141 : vector<8x128xf32>
    %cst_35 = arith.constant 1.000000e+00 : f32
    %143 = vector.broadcast %cst_35 : f32 to vector<8x128xf32>
    %144 = arith.addf %143, %142 : vector<8x128xf32>
    %145 = arith.divf %143, %144 : vector<8x128xf32>
    %146 = vector.extract_strided_slice %145 {offsets = [0, 0], sizes = [8, 64], strides = [1, 1]} : vector<8x128xf32> to vector<8x64xf32>
    %147 = vector.extract_strided_slice %145 {offsets = [0, 64], sizes = [8, 64], strides = [1, 1]} : vector<8x128xf32> to vector<8x64xf32>
    %148 = vector.extract_strided_slice %136 {offsets = [0, 128], sizes = [8, 64], strides = [1, 1]} : vector<8x192xf32> to vector<8x64xf32>
    %149 = vector.extract_strided_slice %137 {offsets = [0, 128], sizes = [8, 64], strides = [1, 1]} : vector<8x192xf32> to vector<8x64xf32>
    %150 = vector.broadcast %9 : vector<1x64xf32> to vector<8x64xf32>
    %151 = arith.addf %149, %150 : vector<8x64xf32>
    %152 = arith.mulf %146, %151 : vector<8x64xf32>
    %153 = arith.addf %148, %152 : vector<8x64xf32>
    %154 = math.tanh %153 : vector<8x64xf32>
    %cst_36 = arith.constant 1.000000e+00 : f32
    %155 = vector.broadcast %cst_36 : f32 to vector<8x64xf32>
    %156 = arith.subf %155, %147 : vector<8x64xf32>
    %157 = arith.mulf %156, %154 : vector<8x64xf32>
    %158 = arith.mulf %147, %134 : vector<8x64xf32>
    %159 = arith.addf %157, %158 : vector<8x64xf32>
    %c40 = arith.constant 40 : index
    %c0_37 = arith.constant 0 : index
    %160 = vector.load %arg12[%c40, %c0_37] : memref<48x64xf32, #tpu.memory_space<vmem>>, vector<8x64xf32>
    tpu.vector_store %arg12[%c40, %c0_37], %159 {strides = array<i32>} : memref<48x64xf32, #tpu.memory_space<vmem>>, vector<8x64xf32>,
    %c0_38 = arith.constant 0 : index
    %c0_39 = arith.constant 0 : index
    %161 = vector.load %arg12[%c0_38, %c0_39] : memref<48x64xf32, #tpu.memory_space<vmem>>, vector<48x64xf32>
    %c0_40 = arith.constant 0 : index
    %c0_41 = arith.constant 0 : index
    %162 = vector.load %arg7[%c0_40, %c0_41] : memref<64x64xf32, #tpu.memory_space<vmem>>, vector<64x64xf32>
    %cst_42 = arith.constant dense<0.000000e+00> : vector<48x64xf32>
    %163 = tpu.matmul %161, %162, %cst_42 {dimension_numbers = #tpu.dot_dimension_numbers<[1], [0], [0], [1], [0, 0, 1, 1], [], []>} : vector<48x64xf32>, vector<64x64xf32>, vector<48x64xf32> -> vector<48x64xf32>
    %c0_43 = arith.constant 0 : index
    %c0_44 = arith.constant 0 : index
    %164 = vector.load %arg8[%c0_43, %c0_44] : memref<1x64xf32, #tpu.memory_space<vmem>>, vector<1x64xf32>
    %165 = vector.broadcast %164 : vector<1x64xf32> to vector<48x64xf32>
    %166 = arith.addf %163, %165 : vector<48x64xf32>
    %167 = math.tanh %166 : vector<48x64xf32>
    %168 = arith.mulf %167, %2 : vector<48x64xf32>
    %169 = vector.extract_strided_slice %168 {offsets = [0, 0], sizes = [8, 64], strides = [1, 1]} : vector<48x64xf32> to vector<8x64xf32>
    %170 = vector.extract_strided_slice %168 {offsets = [8, 0], sizes = [8, 64], strides = [1, 1]} : vector<48x64xf32> to vector<8x64xf32>
    %171 = arith.addf %169, %170 : vector<8x64xf32>
    %172 = vector.extract_strided_slice %168 {offsets = [16, 0], sizes = [8, 64], strides = [1, 1]} : vector<48x64xf32> to vector<8x64xf32>
    %173 = arith.addf %171, %172 : vector<8x64xf32>
    %174 = vector.extract_strided_slice %168 {offsets = [24, 0], sizes = [8, 64], strides = [1, 1]} : vector<48x64xf32> to vector<8x64xf32>
    %175 = arith.addf %173, %174 : vector<8x64xf32>
    %176 = vector.extract_strided_slice %168 {offsets = [32, 0], sizes = [8, 64], strides = [1, 1]} : vector<48x64xf32> to vector<8x64xf32>
    %177 = arith.addf %175, %176 : vector<8x64xf32>
    %178 = vector.extract_strided_slice %168 {offsets = [40, 0], sizes = [8, 64], strides = [1, 1]} : vector<48x64xf32> to vector<8x64xf32>
    %179 = arith.addf %177, %178 : vector<8x64xf32>
    %180 = arith.truncf %179 : vector<8x64xf32> to vector<8x64xbf16>
    %c0_45 = arith.constant 0 : index
    %c0_46 = arith.constant 0 : index
    %181 = vector.load %arg9[%c0_45, %c0_46] : memref<64x128xbf16, #tpu.memory_space<vmem>>, vector<64x128xbf16>
    %cst_47 = arith.constant dense<0.000000e+00> : vector<8x128xf32>
    %182 = tpu.matmul %180, %181, %cst_47 {dimension_numbers = #tpu.dot_dimension_numbers<[1], [0], [0], [1], [0, 0, 1, 1], [], []>} : vector<8x64xbf16>, vector<64x128xbf16>, vector<8x128xf32> -> vector<8x128xf32>
    %c0_48 = arith.constant 0 : index
    %c0_49 = arith.constant 0 : index
    %183 = vector.load %arg10[%c0_48, %c0_49] : memref<1x128xf32, #tpu.memory_space<vmem>>, vector<1x128xf32>
    %184 = vector.broadcast %183 : vector<1x128xf32> to vector<8x128xf32>
    %185 = arith.addf %182, %184 : vector<8x128xf32>
    %c0_50 = arith.constant 0 : index
    %c0_51 = arith.constant 0 : index
    %186 = vector.load %arg11[%c0_50, %c0_51] : memref<8x128xf32, #tpu.memory_space<vmem>>, vector<8x128xf32>
    tpu.vector_store %arg11[%c0_50, %c0_51], %185 {strides = array<i32>} : memref<8x128xf32, #tpu.memory_space<vmem>>, vector<8x128xf32>,
    return
  }
  func.func @transform_0(%arg0: i32) -> (i32, i32) {
    %c0_i32 = arith.constant 0 : i32
    %c0_i32_0 = arith.constant 0 : i32
    return %arg0, %c0_i32 : i32, i32
  }
  func.func @transform_1(%arg0: i32) -> (i32, i32) {
    %c0_i32 = arith.constant 0 : i32
    %c0_i32_0 = arith.constant 0 : i32
    %c0_i32_1 = arith.constant 0 : i32
    return %c0_i32, %c0_i32_0 : i32, i32
  }
  func.func @transform_2(%arg0: i32) -> (i32, i32) {
    %c0_i32 = arith.constant 0 : i32
    %c0_i32_0 = arith.constant 0 : i32
    %c0_i32_1 = arith.constant 0 : i32
    return %c0_i32, %c0_i32_0 : i32, i32
  }
  func.func @transform_3(%arg0: i32) -> (i32, i32) {
    %c0_i32 = arith.constant 0 : i32
    %c0_i32_0 = arith.constant 0 : i32
    %c0_i32_1 = arith.constant 0 : i32
    return %c0_i32, %c0_i32_0 : i32, i32
  }
  func.func @transform_4(%arg0: i32) -> (i32, i32) {
    %c0_i32 = arith.constant 0 : i32
    %c0_i32_0 = arith.constant 0 : i32
    %c0_i32_1 = arith.constant 0 : i32
    return %c0_i32, %c0_i32_0 : i32, i32
  }
  func.func @transform_5(%arg0: i32) -> (i32, i32) {
    %c0_i32 = arith.constant 0 : i32
    %c0_i32_0 = arith.constant 0 : i32
    %c0_i32_1 = arith.constant 0 : i32
    return %c0_i32, %c0_i32_0 : i32, i32
  }
  func.func @transform_6(%arg0: i32) -> (i32, i32) {
    %c0_i32 = arith.constant 0 : i32
    %c0_i32_0 = arith.constant 0 : i32
    %c0_i32_1 = arith.constant 0 : i32
    return %c0_i32, %c0_i32_0 : i32, i32
  }
  func.func @transform_7(%arg0: i32) -> (i32, i32) {
    %c0_i32 = arith.constant 0 : i32
    %c0_i32_0 = arith.constant 0 : i32
    %c0_i32_1 = arith.constant 0 : i32
    return %c0_i32, %c0_i32_0 : i32, i32
  }
  func.func @transform_8(%arg0: i32) -> (i32, i32) {
    %c0_i32 = arith.constant 0 : i32
    %c0_i32_0 = arith.constant 0 : i32
    %c0_i32_1 = arith.constant 0 : i32
    return %c0_i32, %c0_i32_0 : i32, i32
  }
  func.func @transform_9(%arg0: i32) -> (i32, i32) {
    %c0_i32 = arith.constant 0 : i32
    %c0_i32_0 = arith.constant 0 : i32
    %c0_i32_1 = arith.constant 0 : i32
    return %c0_i32, %c0_i32_0 : i32, i32
  }
  func.func @transform_10(%arg0: i32) -> (i32, i32) {
    %c0_i32 = arith.constant 0 : i32
    %c0_i32_0 = arith.constant 0 : i32
    return %arg0, %c0_i32 : i32, i32
  }
}

</mosaic_0001>

<bundles_post_ra>
// kernel: _retain_device.1
= control target key start
LH: loop header
LB: loop body
LE: loop exit
PB: predicated region body
PF: predicated region fallthrough
CT: control target
= control target key end

     0   :  { %s2940_s0 = inlined_call_operand.vmem [shape: bf16[96,36], index: 0, kind: input, shape index: {}]   ;;  %s2941_s1 = inlined_call_operand.hbm [shape: bf16[36,64], index: 1, kind: input, shape index: {}]   ;;  %s2942_s2 = inlined_call_operand.hbm [shape: f32[64,192], index: 2, kind: input, shape index: {}]   ;;  %s2943_s3 = inlined_call_operand.hbm [shape: f32[64,192], index: 3, kind: input, shape index: {}]   ;;  %s2944_s4 = inlined_call_operand.vmem [shape: f32[1,192], index: 4, kind: input, shape index: {}]   ;;  %s2945_s5 = inlined_call_operand.hbm [shape: f32[1,64], index: 5, kind: input, shape index: {}]   ;;  %s2946_s6 = inlined_call_operand.vmem [shape: f32[64,64], index: 6, kind: input, shape index: {}]   ;;  %s2947_s7 = inlined_call_operand.hbm [shape: f32[1,64], index: 7, kind: input, shape index: {}]   ;;  %s2948_s8 = inlined_call_operand.vmem [shape: bf16[64,128], index: 8, kind: input, shape index: {}]   ;;  %s2949_s9 = inlined_call_operand.hbm [shape: f32[1,128], index: 9, kind: input, shape index: {}]   ;;  %s2950_s10 = inlined_call_operand.hbm [shape: f32[16,128], index: 10, kind: output, shape index: {}]  }
   0x1   :  { %2962 = sst [smem:[#allocation26_spill]] %s2942_s2 }
   0x2   :  { %2963 = sst [smem:[#allocation27_spill]] %s2945_s5 }
   0x3   :  { %15 = vsyncpa [#allocation4], 0 }
   0x4   :  { %16 = vsyncpa [#allocation7], 0 }
   0x5   :  { %17 = vsyncpa [#allocation10], 0 }
   0x6   :  { %18 = vsyncpa [#allocation13], 0 }
   0x7   :  { %19 = vsyncpa [#allocation5], 0 }
   0x8   :  { %21 = vsyncpa [#allocation5 + $0x1], 0  ;;  %s2429_s13 = smov 0   ;;  %s2431_s14 = smov 0  }
   0x9   :  { %s2433_s15 = smov 0   ;;  %s2435_s16 = smov 0  }
   0xa LB: > { %2964 = sst [smem:[#allocation20_spill]] %s2346_s13  ;;  %s2450_s17 = sadd.s32 4294967295, %s2358_s16   ;;  %s2358_s16 = sphi %s2435_s16, %s2993_s16   ;;  %s2354_s15 = sphi %s2433_s15, %s2995_s15   ;;  %s2350_s14 = sphi %s2431_s14, %s2997_s14   ;;  %s2346_s13 = sphi %s2429_s13, %s2996_s13  }
   0xb   : > { %2965 = sst [smem:[#allocation21_spill]] %s2354_s15  ;;  %s1677_s18 = sadd.s32 4294967294, %s2358_s16  }
   0xc   : > { %2966 = sst [smem:[#allocation22_spill]] %s2358_s16  ;;  %s2454_s19 = sadd.s32 1, %s2358_s16  }
   0xd   : > { %2967 = sst [smem:[#allocation23_spill]] %s2454_s19  ;;  %s249_s20 = sadd.s32 1, %s2354_s15 }
   0xe   : > { %s246_s21 = ssub.s32 %s2358_s16, %s2454_s19  ;;  %p259_p0 = scmp.ne.s32.totalorder %s2354_s15, %s2350_s14 }
   0xf   : > { %p247_p1 = scmp.eq.s32.totalorder %s246_s21, 0  ;;  %p260_p2 = scmp.eq.s32.totalorder %s2450_s17, 1 }
  0x10   : > { %p265_p3 = scmp.ne.s32.totalorder %s2350_s14, %s2346_s13  ;;  %p266_p4 = scmp.eq.s32.totalorder %s1677_s18, 1 }
  0x11   : > { %s2465_s22 = scalar_select %p247_p1, %s2354_s15, %s249_s20  }
  0x12   : > { %p2467_p5 = por %p260_p2, %p259_p0  ;;  %p2471_p6 = por %p266_p4, %p265_p3 }
  0x13   : > { %2968 = sst [smem:[#allocation24_spill]] %s2465_s22  ;;  %p1678_p7 = scmp.ge.s32.totalorder %s2358_s16, 1 }
  0x14   : > { %s2969_s23 = scalar_select %p2467_p5, 1, 0 }
  0x15   : > { %s2970_s24 = scalar_select %p2471_p6, 1, 0 }
  0x16   : > { %p273_p8 = scmp.lt.s32.totalorder %s2358_s16, 3  ;;  %p2952_p9 = scmp.eq.s32.totalorder %s2450_s17, 0 }
  0x17   : > { %2971 = sst [smem:[#allocation25_spill]] %s2970_s24  ;;  %s2360_s26 = smov [#allocation6]  }
  0x18   : > { %p2478_p10 = pnand %p1678_p7, %p273_p8  ;;  %s298_s27 = sshll.u32 %s2360_s26, 4  ;;  %s2484_s27 = int_to_ptr.vmem [resolvable:$true] %s298_s27 }
  0x19   : > { %s2361_s29 = smov [#allocation9]   ;;  %s2362_s11 = smov [#allocation3]  }
  0x1a   : > { %s2972_s25 = scalar_select %p2478_p10, 1, 0 }
  0x1b   : > { %p1973_p11 = pneg %p2478_p10  ;;  %s328_s30 = sshll.u32 %s2361_s29, 4  ;;  %s2492_s30 = int_to_ptr.vmem [resolvable:$true] %s328_s30 }
  0x1c   : > { %s2494_s12 = sshll.u32 %s2362_s11, 4  ;;  %s2974_s2 = sld [smem:[#allocation26_spill]]  ;;  %s286_s12 = int_to_ptr.vmem [resolvable:$true] %s2494_s12 }
  0x1d   : > { %p2488_p12 = pnand %p2952_p9, %p1973_p11 }
  0x1f   : > { %p2504_p0 = pneg %p2488_p12 }
  0x22   : > { %s2112_s21 = scalar_lea.hbm %s2974_s2, 2048 }
  0x23   : > { %p2113_p13 = scmp.ne.s32.totalorder %s2974_s2, %s2112_s21  ;;  %p2119_p3 = scmp.lt.u32.totalorder %s2112_s21, %s2974_s2 }
  0x25   : > { %p2115_p1 = pnand %p2504_p0, %p2113_p13 }
  0x27   : > { %p2116_p2 = pneg %p2115_p1 }
  0x29   : > { %p2121_p4 = pnand %p2119_p3, %p2116_p2 }
  0x2b   : > { %2124 = shalt.err (!%p2121_p4)
}
  0x2c   : > { %s2125_s22 = scalar_lea.vmem %s2484_s27, 2048  ;;  %p2133_p9 = scmp.lt.s32.totalorder %s2484_s27, %s2484_s27 }
  0x2d   : > { %p2126_p7 = scmp.ne.s32.totalorder %s2484_s27, %s2125_s22  ;;  %p2134_p6 = scmp.lt.s32.totalorder %s2125_s22, %s2125_s22 }
  0x2f   : > { %p2128_p8 = pnand %p2126_p7, %p2504_p0  ;;  %p2135_p13 = por %p2134_p6, %p2133_p9 }
  0x31   : > { %p2129_p11 = pneg %p2128_p8 }
  0x33   : > { %p2136_p1 = pnand %p2135_p13, %p2129_p11 }
  0x35   : > { %2139 = shalt.err (!%p2136_p1)
}
  0x36   : > { %s2960_s18 = smov 256   ;;  %s2961_s20 = smov 16  }
  0x37   : > { %1979 = dma.hbm_to_vmem [thread:$0]  (!%p2488_p12), %s2974_s2, 2048, %s2484_s27, [#allocation7], %s2960_s18, %s2960_s18, %s2961_s20  }
  0x38   : > { %s2976_s5 = sld [smem:[#allocation27_spill]] }
  0x3e   : > { %s2140_s22 = scalar_lea.hbm %s2976_s5, 16 }
  0x3f   : > { %p2141_p6 = scmp.ne.s32.totalorder %s2976_s5, %s2140_s22  ;;  %p2147_p3 = scmp.lt.u32.totalorder %s2140_s22, %s2976_s5 }
  0x41   : > { %p2143_p9 = pnand %p2141_p6, %p2504_p0 }
  0x43   : > { %p2144_p2 = pneg %p2143_p9 }
  0x45   : > { %p2149_p4 = pnand %p2147_p3, %p2144_p2 }
  0x47   : > { %2152 = shalt.err (!%p2149_p4)
}
  0x48   : > { %s2153_s27 = scalar_lea.vmem %s2492_s30, 16  ;;  %s2160_s19 = scalar_lea.vmem %s2492_s30, 32 }
  0x49   : > { %p2154_p7 = scmp.ne.s32.totalorder %s2492_s30, %s2153_s27  ;;  %p2161_p13 = scmp.lt.s32.totalorder %s2492_s30, %s2492_s30 }
  0x4a   : > { %p2162_p1 = scmp.lt.s32.totalorder %s2160_s19, %s2153_s27 }
  0x4b   : > { %p2156_p8 = pnand %p2154_p7, %p2504_p0 }
  0x4c   : > { %p2163_p6 = por %p2162_p1, %p2161_p13 }
  0x4d   : > { %p2157_p11 = pneg %p2156_p8 }
  0x4f   : > { %p2164_p9 = pnand %p2163_p6, %p2157_p11 }
  0x51   : > { %2167 = shalt.err (!%p2164_p9)
}
  0x52   : > { %1985 = dma.hbm_to_vmem [thread:$0]  (!%p2488_p12), %s2976_s5, 16, %s2492_s30, [#allocation10]  }
  0x53   : > { %s2168_s26 = scalar_lea.hbm %s2941_s1, 320 }
  0x54   : > { %p2169_p2 = scmp.ne.s32.totalorder %s2941_s1, %s2168_s26  ;;  %p2175_p7 = scmp.lt.u32.totalorder %s2168_s26, %s2941_s1 }
  0x56   : > { %p2171_p3 = pnand %p2169_p2, %p2504_p0 }
  0x58   : > { %p2172_p4 = pneg %p2171_p3 }
  0x5a   : > { %p2177_p8 = pnand %p2175_p7, %p2172_p4 }
  0x5c   : > { %2180 = shalt.err (!%p2177_p8)
}
  0x5d   : > { %s2181_s19 = scalar_lea.vmem %s286_s12, 320  ;;  %p2189_p6 = scmp.lt.s32.totalorder %s286_s12, %s286_s12 }
  0x5e   : > { %p2182_p11 = scmp.ne.s32.totalorder %s286_s12, %s2181_s19  ;;  %p2190_p9 = scmp.lt.s32.totalorder %s2181_s19, %s2181_s19 }
  0x60   : > { %p2184_p13 = pnand %p2182_p11, %p2504_p0  ;;  %p2191_p5 = por %p2190_p9, %p2189_p6 }
  0x62   : > { %p2185_p1 = pneg %p2184_p13 }
  0x64   : > { %p2192_p10 = pnand %p2191_p5, %p2185_p1 }
  0x66   : > { %2195 = shalt.err (!%p2192_p10)
}
  0x67   : > { %s2365_s30 = smov 64   ;;  %s2366_s13 = smov 4  }
  0x68   : > { %1976 = dma.hbm_to_vmem [thread:$0]  (!%p2488_p12), %s2941_s1, 320, %s286_s12, [#allocation4], %s2365_s30, %s2365_s30, %s2366_s13  }
  0x69   : > { %s2367_s21 = smov [#allocation8]   ;;  %s2368_s29 = smov [#allocation11]  }
  0x6a   : > { %s311_s26 = sshll.u32 %s2367_s21, 4  ;;  %s342_s11 = sshll.u32 %s2368_s29, 4  ;;  %s312_s26 = int_to_ptr.vmem [resolvable:$true] %s311_s26  ;;  %s343_s11 = int_to_ptr.vmem [resolvable:$true] %s342_s11 }
  0x6b   : > { %s2196_s19 = scalar_lea.hbm %s2943_s3, 2048 }
  0x6c   : > { %p2197_p5 = scmp.ne.s32.totalorder %s2943_s3, %s2196_s19  ;;  %p2203_p3 = scmp.lt.u32.totalorder %s2196_s19, %s2943_s3 }
  0x6e   : > { %p2199_p10 = pnand %p2197_p5, %p2504_p0 }
  0x70   : > { %p2200_p2 = pneg %p2199_p10 }
  0x72   : > { %p2205_p4 = pnand %p2203_p3, %p2200_p2 }
  0x74   : > { %2208 = shalt.err (!%p2205_p4)
}
  0x75   : > { %s2209_s12 = scalar_lea.vmem %s312_s26, 2048  ;;  %p2217_p13 = scmp.lt.s32.totalorder %s312_s26, %s312_s26 }
  0x76   : > { %p2210_p7 = scmp.ne.s32.totalorder %s312_s26, %s2209_s12  ;;  %p2218_p1 = scmp.lt.s32.totalorder %s2209_s12, %s2209_s12 }
  0x78   : > { %p2212_p8 = pnand %p2210_p7, %p2504_p0  ;;  %p2219_p6 = por %p2218_p1, %p2217_p13 }
  0x7a   : > { %p2213_p11 = pneg %p2212_p8 }
  0x7c   : > { %p2220_p9 = pnand %p2219_p6, %p2213_p11 }
  0x7e   : > { %2223 = shalt.err (!%p2220_p9)
}
  0x7f   : > { %s2977_s18 = smov 16   ;;  %s2978_s20 = smov 256  }
  0x80   : > { %1982 = dma.hbm_to_vmem [thread:$0]  (!%p2488_p12), %s2943_s3, 2048, %s312_s26, [#allocation7], %s2978_s20, %s2978_s20, %s2977_s18  }
  0x81   : > { %s2224_s16 = scalar_lea.hbm %s2947_s7, 16 }
  0x82   : > { %p2225_p5 = scmp.ne.s32.totalorder %s2947_s7, %s2224_s16  ;;  %p2231_p3 = scmp.lt.u32.totalorder %s2224_s16, %s2947_s7 }
  0x84   : > { %p2227_p10 = pnand %p2225_p5, %p2504_p0 }
  0x86   : > { %p2228_p2 = pneg %p2227_p10 }
  0x88   : > { %p2233_p4 = pnand %p2231_p3, %p2228_p2 }
  0x8a   : > { %2236 = shalt.err (!%p2233_p4)
}
  0x8b   : > { %s2237_s27 = scalar_lea.vmem %s343_s11, 16  ;;  %s2244_s26 = scalar_lea.vmem %s343_s11, 32 }
  0x8c   : > { %p2238_p7 = scmp.ne.s32.totalorder %s343_s11, %s2237_s27  ;;  %p2245_p13 = scmp.lt.s32.totalorder %s343_s11, %s343_s11 }
  0x8d   : > { %p2246_p1 = scmp.lt.s32.totalorder %s2244_s26, %s2237_s27 }
  0x8e   : > { %p2240_p8 = pnand %p2238_p7, %p2504_p0 }
  0x8f   : > { %p2247_p6 = por %p2246_p1, %p2245_p13 }
  0x90   : > { %p2241_p11 = pneg %p2240_p8 }
  0x92   : > { %p2248_p9 = pnand %p2247_p6, %p2241_p11 }
  0x94   : > { %2251 = shalt.err (!%p2248_p9)
}
  0x95   : > { %1988 = dma.hbm_to_vmem [thread:$0]  (!%p2488_p12), %s2947_s7, 16, %s343_s11, [#allocation10]  }
  0x96   : > { %s2369_s18 = smov [#allocation12]   ;;  %s2252_s30 = scalar_lea.hbm %s2949_s9, 16 }
  0x97   : > { %s356_s20 = sshll.u32 %s2369_s18, 4  ;;  %p2253_p5 = scmp.ne.s32.totalorder %s2949_s9, %s2252_s30  ;;  %s357_s20 = int_to_ptr.vmem [resolvable:$true] %s356_s20 }
  0x98   : > { %p2259_p3 = scmp.lt.u32.totalorder %s2252_s30, %s2949_s9 }
  0x99   : > { %p2255_p10 = pnand %p2253_p5, %p2504_p0 }
  0x9b   : > { %p2256_p2 = pneg %p2255_p10 }
  0x9d   : > { %p2261_p4 = pnand %p2259_p3, %p2256_p2 }
  0x9f   : > { %2264 = shalt.err (!%p2261_p4)
}
  0xa0   : > { %s2265_s11 = scalar_lea.vmem %s357_s20, 16  ;;  %s2272_s29 = scalar_lea.vmem %s357_s20, 32 }
  0xa1   : > { %p2266_p7 = scmp.ne.s32.totalorder %s357_s20, %s2265_s11  ;;  %p2273_p13 = scmp.lt.s32.totalorder %s357_s20, %s357_s20 }
  0xa2   : > { %p2274_p1 = scmp.lt.s32.totalorder %s2272_s29, %s2265_s11 }
  0xa3   : > { %p2268_p8 = pnand %p2266_p7, %p2504_p0 }
  0xa4   : > { %p2275_p6 = por %p2274_p1, %p2273_p13 }
  0xa5   : > { %p2269_p11 = pneg %p2268_p8 }
  0xa7   : > { %p2276_p9 = pnand %p2275_p6, %p2269_p11 }
  0xa9   : > { %2279 = shalt.err (!%p2276_p9)
}
  0xaa   : > { %1991 = dma.hbm_to_vmem [thread:$0]  (!%p2488_p12), %s2949_s9, 16, %s357_s20, [#allocation13]  }
  0xab   : > { %p2979_p5 = scmp.ne.s32.totalorder %s2972_s25, 0 }
  0xac   : > { %p2980_p10 = scmp.eq.s32.totalorder (!%p2979_p5), %s2450_s17, 0 }
  0xad   : > { %378 = sbr.rel (%p2979_p5) target bundleno = 3822 (0xeee), region = 60 }
  0xb4   : > { %2325 = dma.done.wait (%p2980_p10), [#allocation4], 320   ;;  %p2981_p0 = pmov %p2980_p10 }
  0xb6   : > { %2327 = vsyncadd (%p2981_p0), [#allocation4], 4294966976  ;;  %p2982_p2 = pmov %p2981_p0 }
  0xb7   : > { %p2983_p3 = pmov %p2981_p0 }
  0xb8   : > { %2329 = dma.done.wait (%p2982_p2), [#allocation7], 4096  }
  0xb9   : > { %2331 = vsyncadd (%p2983_p3), [#allocation7], 4294963200  ;;  %p2984_p4 = pmov %p2981_p0 }
  0xba   : > { %p2985_p12 = pmov %p2981_p0 }
  0xbb   : > { %2333 = dma.done.wait (%p2984_p4), [#allocation10], 32  }
  0xbc   : > { %2335 = vsyncadd (%p2985_p12), [#allocation10], 4294967264  ;;  %p2986_p7 = pmov %p2981_p0 }
  0xbd   : > { %p2987_p8 = pmov %p2981_p0 }
  0xbe   : > { %2337 = dma.done.wait (%p2986_p7), [#allocation13], 16  }
  0xbf   : > { %2339 = vsyncadd (%p2987_p8), [#allocation13], 4294967280  ;;  %s436_s15 = smul.u32 6, %s2450_s17  ;;  %v2370_v0 = vmov 0.0   ;;  %vm2371_vm0 = vmmov 0   ;;  %v2054_v1 = vld [vmem:[#allocation3] sm:$0xff]  }
  0xc0   : > { %1764 = vmatprep.subr.bf16.mxu0 %v2370_v0  ;;  %1770 = vmatprep.mubr.msk.bf16.mxu0 %vm2371_vm0, %v2370_v0  ;;  %v2055_v2 = vld [vmem:[#allocation3 + $0x8] sm:$0xff]   ;;  %v2056_v3 = vld [vmem:[#allocation3 + $0x10] ss:$0 sps:$4 sm:$0x33]   ;;  %vm494_vm1 = vcmask 1041408   ;;  %v704_v4 = vld [vmem:[#allocation8 + $0x8] sm:$0xff] }
  0xc1   : > { %p437_p11 = scmp.lt.s32.totalorder %s436_s15, 11  ;;  %666 = vmatprep.mubr.f32.mxu1 %v2370_v0  ;;  %1765 = vmatpush3.bf16.msra.mxu0 %v2054_v1  ;;  %v706_v5 = vld [vmem:[#allocation8 + $0x18] sm:$0xff]  ;;  %v703_v6 = vld [vmem:[#allocation8] sm:$0xff]  ;;  %v705_v7 = vld [vmem:[#allocation8 + $0x10] sm:$0xff]  ;;  %v496_v9 = vsel %vm494_vm1, %v2056_v3, 0  ;;  %vm484_vm2 = vcmask 293888  }
  0xc2   : > { %1766 = vmatprep.subr.bf16.mxu0 %v2370_v0  ;;  %v556_v8 = vld [vmem:[#allocation6 + $0x8] sm:$0xff]  ;;  %v2659_v11 = vpack.c.bf16 %v706_v5, %v704_v4  ;;  %v710_v13 = vld [vmem:[#allocation8 + $0x38] sm:$0xff]  ;;  %v555_v16 = vld [vmem:[#allocation6] sm:$0xff]  ;;  %v2661_v21 = vpack.c.bf16 %v705_v7, %v703_v6  ;;  %vm583_vm3 = vcmask 523264   ;;  %v573_v7 = vlaneseq  ;;  %s2372_s20 = smov 64   ;;  %s433_s24 = sand.u32 1, %s2350_s14  }
  0xc3   : > { %s2999_s15 = smov (!%p437_p11, %s436_s15), 11  ;;  %v708_v12 = vld [vmem:[#allocation8 + $0x28] sm:$0xff]  ;;  %v558_v14 = vld [vmem:[#allocation6 + $0x18] sm:$0xff]  ;;  %v557_v17 = vld [vmem:[#allocation6 + $0x10] sm:$0xff]  ;;  %s1693_s21 = sshll.u32 %s433_s24, 3 }
  0xc4   : > { %s1694_s25 = sshll.u32 %s2999_s15, 2  ;;  %v1819_v15 = vpack.c.bf16 %v558_v14, %v556_v8  ;;  %v560_v18 = vld [vmem:[#allocation6 + $0x28] sm:$0xff]  ;;  %v1821_v19 = vpack.c.bf16 %v557_v17, %v555_v16  ;;  %v562_v20 = vld [vmem:[#allocation6 + $0x38] sm:$0xff]  ;;  %v559_v23 = vld [vmem:[#allocation6 + $0x20] sm:$0xff]  ;;  %v2664_v25 = vpack.c.bf16 %v710_v13, %v708_v12  ;;  %v574_v8 = vshrl.u32 %v573_v7, 7  ;;  %s1736_s11 = sshll.u32 %s2450_s17, 7 }
  0xc5   : > { %s2654_s19 = scalar_lea.vmem %s2940_s0, %s1694_s25  ;;  %1767 = vmatpush3.bf16.msra.mxu0 %v2055_v2  ;;  %v1823_v22 = vpack.c.bf16 %v562_v20, %v560_v18  ;;  %v561_v24 = vld [vmem:[#allocation6 + $0x30] sm:$0xff]  ;;  %v707_v26 = vld [vmem:[#allocation8 + $0x20] sm:$0xff]  ;;  %v712_v29 = vld [vmem:[#allocation8 + $0x48] sm:$0xff]  ;;  %s435_s29 = scalar_lea.vmem [#allocation14], %s1693_s21 }
  0xc6   : > { %1768 = vmatprep.subr.bf16.mxu0 %v2370_v0  ;;  %v2057_v10 = vld [vmem:[%s2654_s19] sm:$0xff]   ;;  %1820 = vmatprep.subr.bf16.mxu1 %v1819_v15  ;;  %v709_v27 = vld [vmem:[#allocation8 + $0x30] sm:$0xff]  ;;  %v1825_v28 = vpack.c.bf16 %v561_v24, %v559_v23  ;;  %v564_v31 = vld [vmem:[#allocation6 + $0x48] sm:$0xff]  ;;  %v579_v14 = vsub.s32 1, %v574_v8  ;;  %s1558_s22 = sshll.u32 %s435_s29, 4  ;;  %s2898_s25 = scalar_lea.hbm %s2950_s10, %s1736_s11  ;;  %s2900_s22 = int_to_ptr.vmem [resolvable:$true] %s1558_s22 }
  0xc7   : > { %1822 = vmatpush1.bf16.msra.mxu1 %v1821_v19  ;;  %v714_v30 = vld [vmem:[#allocation8 + $0x58] sm:$0xff]  ;;  %v711_v33 = vld [vmem:[#allocation8 + $0x40] sm:$0xff]  ;;  %v565_v36 = vld [vmem:[#allocation6 + $0x50] sm:$0xff]  ;;  %v2670_v37 = vpack.c.bf16 %v709_v27, %v707_v26  ;;  %s1545_s28 = scalar_lea.sflag [#allocation5], %s433_s24  ;;  %s2280_s17 = scalar_lea.vmem %s2900_s22, 128 }
  0xc8   : > { %1824 = vmatprep.subr.bf16.mxu1 %v1823_v22  ;;  %v566_v32 = vld [vmem:[#allocation6 + $0x58] sm:$0xff]  ;;  %v563_v35 = vld [vmem:[#allocation6 + $0x40] sm:$0xff]  ;;  %v713_v38 = vld [vmem:[#allocation8 + $0x50] sm:$0xff]  ;;  %v2674_v42 = vpack.c.bf16 %v714_v30, %v712_v29  ;;  %p2281_p13 = scmp.ne.s32.totalorder %s2900_s22, %s2280_s17  ;;  %p2988_p1 = scmp.ne.s32.totalorder %s2969_s23, 0 }
  0xc9   : > { %1769 = vmatpush3.bf16.msra.mxu0 %v496_v9  ;;  %v1827_v34 = vpack.c.bf16 %v566_v32, %v564_v31  ;;  %v568_v39 = vld [vmem:[#allocation6 + $0x68] sm:$0xff]  ;;  %v570_v40 = vld [vmem:[#allocation6 + $0x78] sm:$0xff]  ;;  %v1829_v43 = vpack.c.bf16 %v565_v36, %v563_v35  ;;  %v567_v46 = vld [vmem:[#allocation6 + $0x60] sm:$0xff]  ;;  %v2677_v49 = vpack.c.bf16 %v713_v38, %v711_v33  ;;  %v575_v9 = vsub.s32 0, %v574_v8  ;;  %s2373_s26 = smov [#allocation14]  }
  0xca   : > { %1836 = vmatprep.subr.bf16.mxu0 %v2659_v11  ;;  %v2058_v41 = vld [vmem:[%s2654_s19 + $0x8] sm:$0xff]   ;;  %v718_v45 = vld [vmem:[#allocation8 + $0x78] sm:$0xff]  ;;  %v1831_v47 = vpack.c.bf16 %v570_v40, %v568_v39  ;;  %v569_v48 = vld [vmem:[#allocation6 + $0x70] sm:$0xff]  ;;  %p2282_p6 = pnand %p2281_p13, %p2988_p1 }
  0xcb   : > { %1826 = vmatpush1.bf16.msra.mxu1 %v1825_v28  ;;  %v716_v44 = vld [vmem:[#allocation8 + $0x68] sm:$0xff]  ;;  %v715_v51 = vld [vmem:[#allocation8 + $0x60] sm:$0xff]  ;;  %v717_v52 = vld [vmem:[#allocation8 + $0x70] sm:$0xff]  ;;  %v1833_v53 = vpack.c.bf16 %v569_v48, %v567_v46 }
  0xcc   : > { %1771 = vmatmul.mubr.msk.bf16.vlgmr.msra.gmra.mrb[0].mxu0 %vm484_vm2, %v2057_v10  ;;  %1828 = vmatprep.subr.bf16.mxu1 %v1827_v34  ;;  %v2680_v50 = vpack.c.bf16 %v718_v45, %v716_v44  ;;  %v2686_v54 = vpack.c.bf16 %v717_v52, %v715_v51  ;;  %v2059_v55 = vld [vmem:[%s2654_s19 + $0x10] sm:$0xff]   ;;  %v571_v10 = vld [vmem:[%s2944_s4] sm:$0x3]  ;;  %v2746_v28 = vld [vmem:[#allocation9] ss:$0 sm:$0xff]  ;;  %p2283_p9 = pneg %p2282_p6  ;;  %s2284_s19 = sshll.u32 %s2373_s26, 4  ;;  %s2285_s19 = int_to_ptr.vmem [resolvable:$false] %s2284_s19 }
  0xcd   : > { %1838 = vmatpush1.bf16.msra.mxu0 %v2661_v21  ;;  %1774 = vmatprep.mubr.msk.bf16.mxu0 %vm2371_vm0, %v2370_v0  ;;  %v576_v12 = vrot.slane %v571_v10, %v575_v9  ;;  %v580_v18 = vrot.slane %v571_v10, %v579_v14  ;;  %s2286_s12 = scalar_lea.vmem %s2285_s19, 256  ;;  %p2287_p5 = scmp.lt.s32.totalorder %s2900_s22, %s2285_s19 }
  0xce   : > { %1840 = vmatprep.subr.bf16.mxu0 %v2664_v25  ;;  %p2288_p10 = scmp.lt.s32.totalorder %s2286_s12, %s2280_s17 }
  0xcf   : > { %1830 = vmatpush1.bf16.msra.mxu1 %v1829_v43 }
  0xd0   : > { %1832 = vmatprep.subr.bf16.mxu1 %v1831_v47  ;;  %p2289_p0 = por %p2288_p10, %p2287_p5 }
  0xd1   : > { %1842 = vmatpush1.bf16.msra.mxu0 %v2670_v37 }
  0xd2   : > { %1844 = vmatprep.subr.bf16.mxu0 %v2674_v42  ;;  %p2290_p2 = pnand %p2289_p0, %p2283_p9 }
  0xd3   : > { %1834 = vmatpush1.bf16.msra.mxu1 %v1833_v53 }
  0xd4   : > { %1775 = vmatmul.mubr.msk.bf16.gmra.mrb[4].mxu0 %vm484_vm2, %v2058_v41  ;;  %1852 = vmatprep.subr.bf16.mxu1 %v2659_v11 }
  0xd5   : > { %1778 = vmatprep.mubr.msk.bf16.mxu0 %vm2371_vm0, %v2370_v0  ;;  %1846 = vmatpush1.bf16.msra.mxu0 %v2677_v49 }
  0xd6   : > { %1848 = vmatprep.subr.bf16.mxu0 %v2680_v50 }
  0xd9   : > { %1850 = vmatpush1.bf16.msra.mxu0 %v2686_v54 }
  0xda   : > { %1868 = vmatprep.subr.bf16.mxu0 %v2659_v11 }
  0xdc   : > { %1779 = vmatmul.mubr.msk.bf16.gmra.mrb[8].mxu0 %vm484_vm2, %v2059_v55 }
  0xdd   : > { %787 = vmatprep.mubr.f32.mxu0 %v2370_v0 }
  0xe4   : > { %788 = vmatmul.mubr.f32.vlgmr.msra.gmra.mrb[12].mxu0 %v2370_v0 }
  0xe5   : > { %1870 = vmatpush1.bf16.msra.mxu0 %v2661_v21  ;;  %987 = vmatprep.mubr.f32.mxu0 %v2370_v0 }
  0xe6   : > { %1872 = vmatprep.subr.bf16.mxu0 %v2664_v25 }
  0xe9   : > { %1874 = vmatpush1.bf16.msra.mxu0 %v2670_v37 }
  0xea   : > { %1876 = vmatprep.subr.bf16.mxu0 %v2674_v42 }
  0xed   : > { %1878 = vmatpush1.bf16.msra.mxu0 %v2677_v49 }
  0xee   : > { %1880 = vmatprep.subr.bf16.mxu0 %v2680_v50 }
  0xf1   : > { %1882 = vmatpush1.bf16.msra.mxu0 %v2686_v54 }
  0xf2   : > { %1900 = vmatprep.subr.bf16.mxu0 %v2659_v11 }
 0x19f   : > { %v2705_v56 = vpop.f32.mrb[0].mxu0 }
 0x1a0   : > { %v1772_v57 = vpop.f32.mrb[1].mxu0  ;;  %1704 = vmatmul.mubr.msk.f32.vlgmr.msra.gmra.mrb[0].mxu1 %vm583_vm3, %v2705_v56 }
 0x1a1   : > { %v2709_v58 = vpop.f32.mrb[2].mxu0  ;;  %672 = vmatprep.mubr.f32.mxu1 %v2370_v0  ;;  %1854 = vmatpush1.bf16.msra.mxu1 %v2661_v21 }
 0x1a2   : > { %v1773_v59 = vpop.f32.mrb[3].mxu0  ;;  %1856 = vmatprep.subr.bf16.mxu1 %v2664_v25 }
 0x1a4   : > { %1705 = vmatmul.mubr.msk.f32.gmra.mrb[2].mxu1 %vm583_vm3, %v2709_v58 }
 0x1a5   : > { %678 = vmatprep.mubr.f32.mxu1 %v2370_v0  ;;  %1858 = vmatpush1.bf16.msra.mxu1 %v2670_v37 }
 0x1a6   : > { %1860 = vmatprep.subr.bf16.mxu1 %v2674_v42 }
 0x1a7   : > { %v2719_v60 = vpop.f32.mrb[4].mxu0 }
 0x1a8   : > { %1706 = vmatmul.mubr.msk.f32.gmra.mrb[4].mxu1 %vm583_vm3, %v2719_v60  ;;  %v1776_v61 = vpop.f32.mrb[5].mxu0 }
 0x1a9   : > { %v2723_v62 = vpop.f32.mrb[6].mxu0  ;;  %684 = vmatprep.mubr.f32.mxu1 %v2370_v0  ;;  %1862 = vmatpush1.bf16.msra.mxu1 %v2677_v49 }
 0x1aa   : > { %v1777_v63 = vpop.f32.mrb[7].mxu0  ;;  %1864 = vmatprep.subr.bf16.mxu1 %v2680_v50 }
 0x1ac   : > { %1707 = vmatmul.mubr.msk.f32.gmra.mrb[6].mxu1 %vm583_vm3, %v2723_v62 }
 0x1ad   : > { %690 = vmatprep.mubr.f32.mxu1 %v2370_v0  ;;  %1866 = vmatpush1.bf16.msra.mxu1 %v2686_v54 }
 0x1ae   : > { %1884 = vmatprep.subr.bf16.mxu1 %v2659_v11 }
 0x1af   : > { %v2733_v1 = vpop.f32.mrb[8].mxu0 }
 0x1b0   : > { %1708 = vmatmul.mubr.msk.f32.gmra.mrb[8].mxu1 %vm583_vm3, %v2733_v1  ;;  %v1780_v2 = vpop.f32.mrb[9].mxu0 }
 0x1b1   : > { %v2737_v3 = vpop.f32.mrb[10].mxu0  ;;  %696 = vmatprep.mubr.f32.mxu1 %v2370_v0 }
 0x1b2   : > { %v1781_v4 = vpop.f32.mrb[11].mxu0 }
 0x1b4   : > { %1709 = vmatmul.mubr.msk.f32.gmra.mrb[10].mxu1 %vm583_vm3, %v2737_v3 }
 0x1b5   : > { %890 = vmatprep.mubr.f32.mxu1 %v2370_v0 }
 0x1b7   : > { %v789_v5 = vpop.f32.mrb[12].mxu0 }
 0x1b8   : > { %v791_v6 = vpop.f32.mrb[13].mxu0 }
 0x1b9   : > { %v807_v29 = vadd.f32 %v2746_v28, %v791_v6 }
 0x273   : > { %v668_v13 = vpop.f32.mrb[0].mxu1 }
 0x274   : > { %v669_v15 = vadd.f32 %v668_v13, %v576_v12  ;;  %v670_v16 = vpop.f32.mrb[1].mxu1 }
 0x275   : > { %v671_v31 = vadd.f32 %v670_v16, %v580_v18 }
 0x276   : > { %v794_v17 = vadd.f32 %v789_v5, %v669_v15 }
 0x277   : > { %v674_v19 = vpop.f32.mrb[2].mxu1 }
 0x278   : > { %v1710_v20 = vmul.f32 -1.442695, %v794_v17  ;;  %v675_v22 = vadd.f32 %v674_v19, %v576_v12  ;;  %v676_v23 = vpop.f32.mrb[3].mxu1 }
 0x279   : > { %v677_v24 = vadd.f32 %v676_v23, %v580_v18 }
 0x27a   : > { %2064 = vpow2.f32 %v1710_v20 }
 0x27b   : > { %v680_v34 = vpop.f32.mrb[4].mxu1 }
 0x27c   : > { %v2749_v35 = vadd.f32 %v680_v34, %v576_v12  ;;  %v682_v36 = vpop.f32.mrb[5].mxu1 }
 0x27d   : > { %v2751_v38 = vadd.f32 %v682_v36, %v580_v18 }
 0x27f   : > { %v686_v39 = vpop.f32.mrb[6].mxu1 }
 0x280   : > { %v2753_v40 = vadd.f32 %v686_v39, %v576_v12  ;;  %v688_v41 = vpop.f32.mrb[7].mxu1 }
 0x281   : > { %v2755_v43 = vadd.f32 %v688_v41, %v580_v18 }
 0x283   : > { %v692_v44 = vpop.f32.mrb[8].mxu1 }
 0x284   : > { %v2065_v26 = vpop.eup %2064  ;;  %v2757_v45 = vadd.f32 %v692_v44, %v576_v12  ;;  %v694_v46 = vpop.f32.mrb[9].mxu1 }
 0x285   : > { %v798_v27 = vadd.f32 1.0, %v2065_v26  ;;  %v2759_v47 = vadd.f32 %v694_v46, %v580_v18 }
 0x287   : > { %2066 = vrcp.f32 %v798_v27  ;;  %v698_v48 = vpop.f32.mrb[10].mxu1 }
 0x288   : > { %v2761_v51 = vadd.f32 %v698_v48, %v576_v12  ;;  %v700_v52 = vpop.f32.mrb[11].mxu1 }
 0x289   : > { %v2763_v55 = vadd.f32 %v700_v52, %v580_v18 }
 0x291   : > { %v2067_v30 = vpop.eup %2066 }
 0x292   : > { %v808_v32 = vmul.f32 %v2067_v30, %v807_v29  ;;  %v811_v57 = vsub.f32 1.0, %v2067_v30  ;;  %v817_v61 = vmul.f32 0.0, %v2067_v30 }
 0x294   : > { %v809_v33 = vadd.f32 %v808_v32, %v671_v31 }
 0x296   : > { %2068 = vtanh.f32 %v809_v33 }
 0x2a0   : > { %v2069_v53 = vpop.eup %2068 }
 0x2a1   : > { %813 = vrot.lane.b32.xlu0 %v2069_v53, %s2372_s20 }
 0x313   : > { %v814_v59 = vpop.permute.xlu0 %813 }
 0x314   : > { %v816_v63 = vmul.f32 %v814_v59, %v811_v57 }
 0x316   : > { %v818_v2 = vadd.f32 %v817_v61, %v816_v63 }
 0x318   : > { %820 = vrot.lane.b32.xlu0 %v818_v2, %s2372_s20 }
 0x38a   : > { %v821_v4 = vpop.permute.xlu0 %820 }
 0x38b   : > { %823 = vst.msk [vmem:[#allocation2] sm:$0xff] %vm583_vm3, %v821_v4  ;;  %1712 = vmatmul.mubr.msk.f32.vlgmr.msra.gmra.mrb[12].mxu1 %vm583_vm3, %v821_v4 }
 0x38c   : > { %1886 = vmatpush1.bf16.msra.mxu1 %v2661_v21  ;;  %1084 = vmatprep.mubr.f32.mxu1 %v2370_v0 }
 0x38d   : > { %1888 = vmatprep.subr.bf16.mxu1 %v2664_v25 }
 0x390   : > { %1890 = vmatpush1.bf16.msra.mxu1 %v2670_v37 }
 0x391   : > { %1892 = vmatprep.subr.bf16.mxu1 %v2674_v42 }
 0x394   : > { %1894 = vmatpush1.bf16.msra.mxu1 %v2677_v49 }
 0x395   : > { %1896 = vmatprep.subr.bf16.mxu1 %v2680_v50 }
 0x398   : > { %1898 = vmatpush1.bf16.msra.mxu1 %v2686_v54 }
 0x399   : > { %1916 = vmatprep.subr.bf16.mxu1 %v2659_v11 }
 0x45e   : > { %v892_v5 = vpop.f32.mrb[12].mxu1 }
 0x45f   : > { %v897_v6 = vadd.f32 %v892_v5, %v675_v22  ;;  %v894_v7 = vpop.f32.mrb[13].mxu1 }
 0x460   : > { %v904_v12 = vadd.f32 %v2746_v28, %v894_v7  ;;  %v1318_v7 = vld [vmem:[%s2946_s6 + $0x18] sm:$0xff] }
 0x461   : > { %v1713_v8 = vmul.f32 -1.442695, %v897_v6 }
 0x463   : > { %2070 = vpow2.f32 %v1713_v8 }
 0x46d   : > { %v2071_v9 = vpop.eup %2070 }
 0x46e   : > { %v901_v10 = vadd.f32 1.0, %v2071_v9 }
 0x470   : > { %2072 = vrcp.f32 %v901_v10  ;;  %v1319_v10 = vld [vmem:[%s2946_s6 + $0x20] sm:$0xff] }
 0x47a   : > { %v2073_v13 = vpop.eup %2072 }
 0x47b   : > { %v905_v14 = vmul.f32 %v2073_v13, %v904_v12  ;;  %v908_v17 = vsub.f32 1.0, %v2073_v13  ;;  %v914_v11 = vmul.f32 %v2073_v13, %v818_v2  ;;  %v1320_v12 = vld [vmem:[%s2946_s6 + $0x28] sm:$0xff]  ;;  %v1309_v13 = vld [vmem:[#allocation2] sm:$0xff] }
 0x47d   : > { %v906_v15 = vadd.f32 %v905_v14, %v677_v24  ;;  %v1939_v14 = vpack.c.bf16 %v1320_v12, %v1319_v10 }
 0x47f   : > { %2074 = vtanh.f32 %v906_v15  ;;  %v1321_v15 = vld [vmem:[%s2946_s6 + $0x30] sm:$0xff] }
 0x489   : > { %v2075_v16 = vpop.eup %2074 }
 0x48a   : > { %910 = vrot.lane.b32.xlu1 %v2075_v16, %s2372_s20  ;;  %v1322_v16 = vld [vmem:[%s2946_s6 + $0x38] sm:$0xff] }
 0x4fc   : > { %v911_v18 = vpop.permute.xlu1 %910 }
 0x4fd   : > { %v913_v19 = vmul.f32 %v911_v18, %v908_v17  ;;  %v1943_v17 = vpack.c.bf16 %v1322_v16, %v1321_v15 }
 0x4ff   : > { %v915_v20 = vadd.f32 %v914_v11, %v913_v19 }
 0x501   : > { %917 = vrot.lane.b32.xlu1 %v915_v20, %s2372_s20 }
 0x573   : > { %v918_v22 = vpop.permute.xlu1 %917 }
 0x574   : > { %920 = vst.msk [vmem:[#allocation2 + $0x8] sm:$0xff] %vm583_vm3, %v918_v22  ;;  %1714 = vmatmul.mubr.msk.f32.vlgmr.msra.gmra.mrb[14].mxu0 %vm583_vm3, %v918_v22 }
 0x575   : > { %1902 = vmatpush1.bf16.msra.mxu0 %v2661_v21  ;;  %1181 = vmatprep.mubr.f32.mxu0 %v2370_v0 }
 0x576   : > { %1904 = vmatprep.subr.bf16.mxu0 %v2664_v25 }
 0x579   : > { %1906 = vmatpush1.bf16.msra.mxu0 %v2670_v37 }
 0x57a   : > { %1908 = vmatprep.subr.bf16.mxu0 %v2674_v42 }
 0x57b   : > { %v1310_v18 = vld [vmem:[#allocation2 + $0x8] sm:$0xff] }
 0x57d   : > { %1910 = vmatpush1.bf16.msra.mxu0 %v2677_v49 }
 0x57e   : > { %1912 = vmatprep.subr.bf16.mxu0 %v2680_v50 }
 0x581   : > { %1914 = vmatpush1.bf16.msra.mxu0 %v2686_v54 }
 0x647   : > { %v989_v23 = vpop.f32.mrb[14].mxu0 }
 0x648   : > { %v994_v24 = vadd.f32 %v989_v23, %v2749_v35  ;;  %v991_v26 = vpop.f32.mrb[15].mxu0 }
 0x649   : > { %v1001_v31 = vadd.f32 %v2746_v28, %v991_v26  ;;  %v2846_v26 = vld [vmem:[#allocation11] ss:$0 sm:$0xff] }
 0x64a   : > { %v1715_v27 = vmul.f32 -1.442695, %v994_v24 }
 0x64c   : > { %2076 = vpow2.f32 %v1715_v27 }
 0x656   : > { %v2077_v29 = vpop.eup %2076 }
 0x657   : > { %v998_v30 = vadd.f32 1.0, %v2077_v29 }
 0x659   : > { %2078 = vrcp.f32 %v998_v30 }
 0x663   : > { %v2079_v32 = vpop.eup %2078 }
 0x664   : > { %v1002_v33 = vmul.f32 %v2079_v32, %v1001_v31  ;;  %v1005_v39 = vsub.f32 1.0, %v2079_v32  ;;  %v1011_v44 = vmul.f32 %v2079_v32, %v915_v20 }
 0x666   : > { %v1003_v34 = vadd.f32 %v1002_v33, %v2751_v38 }
 0x668   : > { %2080 = vtanh.f32 %v1003_v34 }
 0x672   : > { %v2081_v36 = vpop.eup %2080 }
 0x673   : > { %1007 = vrot.lane.b32.xlu0 %v2081_v36, %s2372_s20 }
 0x6e5   : > { %v1008_v41 = vpop.permute.xlu0 %1007 }
 0x6e6   : > { %v1010_v35 = vmul.f32 %v1008_v41, %v1005_v39 }
 0x6e8   : > { %v1012_v46 = vadd.f32 %v1011_v44, %v1010_v35 }
 0x6ea   : > { %1014 = vrot.lane.b32.xlu1 %v1012_v46, %s2372_s20 }
 0x75c   : > { %v1015_v48 = vpop.permute.xlu1 %1014 }
 0x75d   : > { %1017 = vst.msk [vmem:[#allocation2 + $0x10] sm:$0xff] %vm583_vm3, %v1015_v48  ;;  %1716 = vmatmul.mubr.msk.f32.vlgmr.msra.gmra.mrb[14].mxu1 %vm583_vm3, %v1015_v48 }
 0x75e   : > { %1918 = vmatpush1.bf16.msra.mxu1 %v2661_v21  ;;  %1278 = vmatprep.mubr.f32.mxu1 %v2370_v0 }
 0x75f   : > { %1920 = vmatprep.subr.bf16.mxu1 %v2664_v25 }
 0x762   : > { %1922 = vmatpush1.bf16.msra.mxu1 %v2670_v37 }
 0x763   : > { %1924 = vmatprep.subr.bf16.mxu1 %v2674_v42 }
 0x764   : > { %v1311_v11 = vld [vmem:[#allocation2 + $0x10] sm:$0xff] }
 0x766   : > { %1926 = vmatpush1.bf16.msra.mxu1 %v2677_v49 }
 0x767   : > { %1928 = vmatprep.subr.bf16.mxu1 %v2680_v50  ;;  %v1315_v50 = vld [vmem:[%s2946_s6] sm:$0xff] }
 0x76a   : > { %1930 = vmatpush1.bf16.msra.mxu1 %v2686_v54  ;;  %v1316_v54 = vld [vmem:[%s2946_s6 + $0x8] sm:$0xff] }
 0x76b   : > { %1807 = vmatprep.subr.bf16.mxu1 %v2370_v0 }
 0x830   : > { %v1086_v38 = vpop.f32.mrb[14].mxu1 }
 0x831   : > { %v1091_v52 = vadd.f32 %v1086_v38, %v2753_v40  ;;  %v1088_v21 = vpop.f32.mrb[15].mxu1  ;;  %v1931_v40 = vpack.c.bf16 %v1316_v54, %v1315_v50 }
 0x832   : > { %v1098_v37 = vadd.f32 %v2746_v28, %v1088_v21 }
 0x833   : > { %v1717_v53 = vmul.f32 -1.442695, %v1091_v52  ;;  %1932 = vmatprep.subr.bf16.mxu0 %v1931_v40 }
 0x835   : > { %2082 = vpow2.f32 %v1717_v53 }
 0x83f   : > { %v2083_v57 = vpop.eup %2082 }
 0x840   : > { %v1095_v25 = vadd.f32 1.0, %v2083_v57 }
 0x842   : > { %2084 = vrcp.f32 %v1095_v25 }
 0x84c   : > { %v2085_v42 = vpop.eup %2084 }
 0x84d   : > { %v1099_v59 = vmul.f32 %v2085_v42, %v1098_v37  ;;  %v1102_v63 = vsub.f32 1.0, %v2085_v42  ;;  %v1108_v4 = vmul.f32 %v2085_v42, %v1012_v46 }
 0x84f   : > { %v1100_v49 = vadd.f32 %v1099_v59, %v2755_v43  ;;  %v1317_v43 = vld [vmem:[%s2946_s6 + $0x10] sm:$0xff] }
 0x850   : > { %v1935_v8 = vpack.c.bf16 %v1318_v7, %v1317_v43 }
 0x851   : > { %2086 = vtanh.f32 %v1100_v49 }
 0x85b   : > { %v2087_v61 = vpop.eup %2086 }
 0x85c   : > { %1104 = vrot.lane.b32.xlu0 %v2087_v61, %s2372_s20 }
 0x8ce   : > { %v1105_v2 = vpop.permute.xlu0 %1104 }
 0x8cf   : > { %v1107_v5 = vmul.f32 %v1105_v2, %v1102_v63 }
 0x8d1   : > { %v2817_v6 = vadd.f32 %v1108_v4, %v1107_v5 }
 0x8d3   : > { %1111 = vrot.lane.b32.xlu1 %v2817_v6, %s2372_s20 }
 0x945   : > { %v1112_v9 = vpop.permute.xlu1 %1111 }
 0x946   : > { %1114 = vst.msk [vmem:[#allocation2 + $0x18] sm:$0xff] %vm583_vm3, %v1112_v9  ;;  %1718 = vmatmul.mubr.msk.f32.vlgmr.msra.gmra.mrb[16].mxu0 %vm583_vm3, %v1112_v9 }
 0x947   : > { %1934 = vmatpush3.bf16.msra.mxu0 %v1931_v40  ;;  %1798 = vmatprep.mubr.msk.f32.mxu0 %vm583_vm3, %v1309_v13 }
 0x948   : > { %1936 = vmatprep.subr.bf16.mxu0 %v1935_v8 }
 0x94b   : > { %1938 = vmatpush3.bf16.msra.mxu0 %v1935_v8 }
 0x94c   : > { %1940 = vmatprep.subr.bf16.mxu0 %v1939_v14 }
 0x94d   : > { %v1312_v19 = vld [vmem:[#allocation2 + $0x18] sm:$0xff] }
 0x94f   : > { %1942 = vmatpush3.bf16.msra.mxu0 %v1939_v14 }
 0x950   : > { %1944 = vmatprep.subr.bf16.mxu0 %v1943_v17 }
 0x953   : > { %1946 = vmatpush3.bf16.msra.mxu0 %v1943_v17 }
 0x956   : > { %1799 = vmatmul.mubr.msk.f32.vlgmr.msra.gmra.mrb[18].mxu0 %vm583_vm3, %v1310_v18  ;;  %v2062_v18 = vld [vmem:[%s2948_s8 + $0x10] sm:$0xff]  }
 0x957   : > { %1801 = vmatprep.mubr.msk.f32.mxu0 %vm583_vm3, %v1311_v11  ;;  %v2063_v11 = vld [vmem:[%s2948_s8 + $0x18] sm:$0xff]  }
 0x95a   : > { %1802 = vmatmul.mubr.msk.f32.gmra.mrb[20].mxu0 %vm583_vm3, %v1312_v19 }
 0xa19   : > { %v1183_v20 = vpop.f32.mrb[16].mxu0 }
 0xa1a   : > { %v1188_v22 = vadd.f32 %v1183_v20, %v2757_v45  ;;  %v1185_v23 = vpop.f32.mrb[17].mxu0 }
 0xa1b   : > { %v1195_v41 = vadd.f32 %v2746_v28, %v1185_v23 }
 0xa1c   : > { %v1719_v24 = vmul.f32 -1.442695, %v1188_v22 }
 0xa1e   : > { %2088 = vpow2.f32 %v1719_v24 }
 0xa28   : > { %v2089_v27 = vpop.eup %2088 }
 0xa29   : > { %v1192_v29 = vadd.f32 1.0, %v2089_v27  ;;  %v1800_v30 = vpop.f32.mrb[18].mxu0 }
 0xa2a   : > { %v1420_v31 = vadd.f32 %v1800_v30, %v2846_v26  ;;  %v1414_v32 = vpop.f32.mrb[19].mxu0 }
 0xa2b   : > { %2090 = vrcp.f32 %v1192_v29  ;;  %v1415_v33 = vadd.f32 %v2846_v26, %v1414_v32 }
 0xa2c   : > { %2092 = vtanh.f32 %v1420_v31 }
 0xa2d   : > { %2094 = vtanh.f32 %v1415_v33  ;;  %v1803_v34 = vpop.f32.mrb[20].mxu0  ;;  %v1729_v33 = vld [vmem:[#allocation12] ss:$0 sm:$0xff] }
 0xa2e   : > { %v1430_v36 = vadd.f32 %v1803_v34, %v2846_v26  ;;  %v1424_v45 = vpop.f32.mrb[21].mxu0 }
 0xa2f   : > { %v1425_v39 = vadd.f32 %v2846_v26, %v1424_v45 }
 0xa30   : > { %2096 = vtanh.f32 %v1430_v36 }
 0xa31   : > { %2098 = vtanh.f32 %v1425_v39 }
 0xa35   : > { %v2091_v44 = vpop.eup %2090 }
 0xa36   : > { %v2093_v35 = vpop.eup %2092  ;;  %v1196_v46 = vmul.f32 %v2091_v44, %v1195_v41  ;;  %v1199_v54 = vsub.f32 1.0, %v2091_v44 }
 0xa37   : > { %v2095_v48 = vpop.eup %2094  ;;  %v1450_v38 = vmul.f32 %v2093_v35, %v2709_v58  ;;  %v1205_v58 = vmul.f32 %v2091_v44, %v2817_v6 }
 0xa38   : > { %v1197_v52 = vadd.f32 %v1196_v46, %v2759_v47  ;;  %v1449_v21 = vmul.f32 %v2095_v48, %v2705_v56 }
 0xa3a   : > { %v2097_v53 = vpop.eup %2096  ;;  %2100 = vtanh.f32 %v1197_v52  ;;  %v1455_v57 = vadd.f32 %v1450_v38, %v1449_v21 }
 0xa3b   : > { %v2099_v25 = vpop.eup %2098  ;;  %v1452_v37 = vmul.f32 %v2097_v53, %v2723_v62 }
 0xa3c   : > { %v1451_v42 = vmul.f32 %v2099_v25, %v2719_v60 }
 0xa3e   : > { %v1456_v59 = vadd.f32 %v1455_v57, %v1451_v42 }
 0xa40   : > { %v1457_v49 = vadd.f32 %v1456_v59, %v1452_v37 }
 0xa44   : > { %v2101_v50 = vpop.eup %2100 }
 0xa45   : > { %1201 = vrot.lane.b32.xlu0 %v2101_v50, %s2372_s20 }
 0xab7   : > { %v1202_v40 = vpop.permute.xlu0 %1201 }
 0xab8   : > { %v1204_v47 = vmul.f32 %v1202_v40, %v1199_v54 }
 0xaba   : > { %v1206_v61 = vadd.f32 %v1205_v58, %v1204_v47 }
 0xabc   : > { %1208 = vrot.lane.b32.xlu1 %v1206_v61, %s2372_s20 }
 0xb2e   : > { %v1209_v56 = vpop.permute.xlu1 %1208 }
 0xb2f   : > { %1211 = vst.msk [vmem:[#allocation2 + $0x20] sm:$0xff] %vm583_vm3, %v1209_v56  ;;  %1720 = vmatmul.mubr.msk.f32.vlgmr.msra.gmra.mrb[16].mxu1 %vm583_vm3, %v1209_v56 }
 0xb30   : > { %1815 = vmatprep.mubr.msk.bf16.mxu1 %vm2371_vm0, %v2370_v0 }
 0xb36   : > { %v1313_v60 = vld [vmem:[#allocation2 + $0x20] sm:$0xff] }
 0xb37   : > { %1804 = vmatprep.mubr.msk.f32.mxu0 %vm583_vm3, %v1313_v60 }
 0xc02   : > { %v1280_v62 = vpop.f32.mrb[16].mxu1 }
 0xc03   : > { %v1285_v63 = vadd.f32 %v1280_v62, %v2761_v51  ;;  %v1282_v2 = vpop.f32.mrb[17].mxu1 }
 0xc04   : > { %v1292_v43 = vadd.f32 %v2746_v28, %v1282_v2  ;;  %v2060_v28 = vld [vmem:[%s2948_s8] sm:$0xff]  }
 0xc05   : > { %v1721_v4 = vmul.f32 -1.442695, %v1285_v63  ;;  %1808 = vmatpush3.bf16.msra.mxu1 %v2060_v28 }
 0xc06   : > { %1809 = vmatprep.subr.bf16.mxu1 %v2370_v0 }
 0xc07   : > { %2102 = vpow2.f32 %v1721_v4 }
 0xc11   : > { %v2103_v5 = vpop.eup %2102 }
 0xc12   : > { %v1289_v6 = vadd.f32 1.0, %v2103_v5 }
 0xc14   : > { %2104 = vrcp.f32 %v1289_v6 }
 0xc1e   : > { %v2105_v7 = vpop.eup %2104 }
 0xc1f   : > { %v1293_v8 = vmul.f32 %v2105_v7, %v1292_v43  ;;  %v1296_v12 = vsub.f32 1.0, %v2105_v7  ;;  %v1302_v14 = vmul.f32 %v2105_v7, %v1206_v61 }
 0xc21   : > { %v1294_v9 = vadd.f32 %v1293_v8, %v2763_v55  ;;  %v2061_v55 = vld [vmem:[%s2948_s8 + $0x8] sm:$0xff]  }
 0xc22   : > { %1810 = vmatpush3.bf16.msra.mxu1 %v2061_v55 }
 0xc23   : > { %2106 = vtanh.f32 %v1294_v9  ;;  %1811 = vmatprep.subr.bf16.mxu1 %v2370_v0 }
 0xc26   : > { %1812 = vmatpush3.bf16.msra.mxu1 %v2062_v18 }
 0xc27   : > { %1813 = vmatprep.subr.bf16.mxu1 %v2370_v0 }
 0xc2a   : > { %1814 = vmatpush3.bf16.msra.mxu1 %v2063_v11 }
 0xc2d   : > { %v2107_v10 = vpop.eup %2106 }
 0xc2e   : > { %1298 = vrot.lane.b32.xlu0 %v2107_v10, %s2372_s20 }
 0xca0   : > { %v1299_v13 = vpop.permute.xlu0 %1298 }
 0xca1   : > { %v1301_v51 = vmul.f32 %v1299_v13, %v1296_v12 }
 0xca3   : > { %v1303_v15 = vadd.f32 %v1302_v14, %v1301_v51 }
 0xca5   : > { %1305 = vrot.lane.b32.xlu1 %v1303_v15, %s2372_s20 }
 0xd17   : > { %v1306_v16 = vpop.permute.xlu1 %1305 }
 0xd18   : > { %1308 = vst.msk [vmem:[#allocation2 + $0x28] sm:$0xff] %vm583_vm3, %v1306_v16 }
 0xd1f   : > { %v1314_v17 = vld [vmem:[#allocation2 + $0x28] sm:$0xff] }
 0xd20   : > { %1805 = vmatmul.mubr.msk.f32.gmra.mrb[22].mxu0 %vm583_vm3, %v1314_v17 }
 0xdf3   : > { %v1806_v19 = vpop.f32.mrb[22].mxu0 }
 0xdf4   : > { %v1440_v20 = vadd.f32 %v1806_v19, %v2846_v26  ;;  %v1434_v22 = vpop.f32.mrb[23].mxu0 }
 0xdf5   : > { %v1435_v23 = vadd.f32 %v2846_v26, %v1434_v22 }
 0xdf6   : > { %2108 = vtanh.f32 %v1440_v20 }
 0xdf7   : > { %2110 = vtanh.f32 %v1435_v23 }
 0xe00   : > { %v2109_v24 = vpop.eup %2108 }
 0xe01   : > { %v2111_v27 = vpop.eup %2110  ;;  %v1454_v29 = vmul.f32 %v2109_v24, %v2737_v3 }
 0xe02   : > { %v1453_v30 = vmul.f32 %v2111_v27, %v2733_v1 }
 0xe04   : > { %v1458_v31 = vadd.f32 %v1457_v49, %v1453_v30 }
 0xe06   : > { %v1459_v32 = vadd.f32 %v1458_v31, %v1454_v29 }
 0xe08   : > { %v1460_v0 = vpack.c.bf16 %v1459_v32, %v1459_v32 }
 0xe0a   : > { %1816 = vmatmul.mubr.msk.bf16.vlgmr.msra.gmra.mrb[20].mxu1 %vm583_vm3, %v1460_v0 }
 0xedd   : > { %v1537_v26 = vpop.f32.mrb[20].mxu1 }
 0xede   : > { %v1538_v34 = vadd.f32 %v1729_v33, %v1537_v26  ;;  %v1817_v36 = vpop.f32.mrb[21].mxu1 }
 0xedf   : > { %v1540_v1 = vpop.f32.mrb[22].mxu1 }
 0xee0   : > { %1543 = vst [vmem:[%s435_s29] sm:$0xff] %v1538_v34  ;;  %v1818_v3 = vpop.f32.mrb[23].mxu1 }
 0xee1   : > { %2293 = shalt.err (!%p2290_p2)
}
 0xee2   : > { %s2294_s18 = scalar_lea.hbm %s2898_s25, 128  ;;  %s2298_s20 = scalar_lea.hbm %s2950_s10, 256 }
 0xee3   : > { %p2295_p3 = scmp.ne.s32.totalorder %s2898_s25, %s2294_s18  ;;  %p2299_p7 = scmp.lt.u32.totalorder %s2898_s25, %s2950_s10 }
 0xee4   : > { %p2300_p8 = scmp.lt.u32.totalorder %s2298_s20, %s2294_s18  ;;  %p2302_p13 = scmp.lt.u32.totalorder %s2294_s18, %s2898_s25 }
 0xee5   : > { %p2296_p4 = pnand %p2295_p3, %p2988_p1 }
 0xee6   : > { %p2301_p11 = por %p2300_p8, %p2299_p7 }
 0xee7   : > { %p2297_p12 = pneg %p2296_p4 }
 0xee8   : > { %p2303_p6 = por %p2302_p13, %p2301_p11 }
 0xeea   : > { %p2304_p9 = pnand %p2303_p6, %p2297_p12 }
 0xeec   : > { %2307 = shalt.err (!%p2304_p9)
}
 0xeed   : > { %1971 = dma.vmem_to_hbm [thread:$0]  (%p2988_p1), %s2900_s22, 128, %s2898_s25, %s1545_s28  }
 0xeee PF: > { %s2989_s16 = sld [smem:[#allocation22_spill]]  ;;  %s2990_s24 = sld [smem:[#allocation20_spill]] }
 0xeef   : > { %s2991_s21 = sld [smem:[#allocation25_spill]] }
 0xef4   : > { %p2008_p5 = scmp.ge.s32.totalorder %s2989_s16, 2  ;;  %s1570_s11 = sand.u32 1, %s2990_s24  }
 0xef5   : > { %p2992_p10 = scmp.ne.s32.totalorder %s2991_s21, 0  ;;  %s1571_s29 = scalar_lea.sflag [#allocation5], %s1570_s11 }
 0xef7   : > { %p1993_p0 = pnand %p2008_p5, %p2992_p10 }
 0xef9   : > { %2341 = dma.done.wait (!%p1993_p0), %s1571_s29, 128  }
 0xefa   : > { %2343 = vsyncadd (!%p1993_p0), %s1571_s29, 4294967168  ;;  %s2993_s16 = sld [smem:[#allocation23_spill]]  ;;  %s2994_s27 = sld [smem:[#allocation21_spill]] }
 0xefb   : > { %s2995_s15 = sld [smem:[#allocation24_spill]]  ;;  %s2996_s13 = smov %s2350_s14 }
 0xf00   : > { %p24_p2 = scmp.ge.s32.totalorder %s2993_s16, 4   ;;  %s2997_s14 = smov %s2994_s27 }
 0xf02   :  { %26 = sbr.rel (!%p24_p2) target bundleno = 10 (0xa), region = 120 }
 0xf09   :  { %1576 = vsyncpa [#allocation4], 1 }
 0xf0a   :  { %1578 = vsyncpa [#allocation4 + $0x1], 1 }
 0xf0b   :  { %1579 = vsyncpa [#allocation7], 1 }
 0xf0c   :  { %1580 = vsyncpa [#allocation10], 1 }
 0xf0d   :  { %1581 = vsyncpa [#allocation13], 1 }
 0xf0e   :  { %1582 = vsyncpa [#allocation5], 1 }
 0xf0f   :  { %1584 = vsyncpa [#allocation5 + $0x1], 1 }

</bundles_post_ra>
